<compile_context>
chip_gen: v5e
topology: v5e:2x2
jax: 0.10.0
libtpu: 0.0.40
codegen_flags: <defaults>
</compile_context>

<pallas_src>
import functools

import jax
import jax.numpy as jnp
from jax import lax
from jax.experimental import pallas as pl
from jax.experimental.pallas import tpu as pltpu


def _prologue_kernel(x_ref, y_ref, m_ref, v_ref, ga_ref, cb_ref, parts_ref):
    """Per-tile partials needed BEFORE the loop: non-NaN count of dy0 (nansum divisor
    d_obs) and the three pieces of sum(grad(x0)^2) (for normgrad)."""
    x0 = x_ref[...]
    y = y_ref[...]
    m = m_ref[...]
    v = v_ref[...]                                   # (1, TN) pad-validity mask

    dy0 = (x0 - y) * m                               # raw (keeps NaN for the count)
    cnt = jnp.sum(jnp.logical_not(jnp.isnan(dy0)).astype(jnp.float32) * v,
                  axis=(0, 1), keepdims=True)
    # sanitize y for the gradient pieces (0 * NaN would otherwise poison the sums)
    y_s = jnp.where(jnp.isnan(y), jnp.float32(0.0), y)
    # grad(x0) = gA / d_reg + gB / d_obs   (divisors applied in the wrapper)
    gA = jnp.dot(ga_ref[...], x0, preferred_element_type=jnp.float32) * v
    gB = cb_ref[...] * (x0 - y_s) * m * m * v
    sA = jnp.sum(gA * gA, axis=(0, 1), keepdims=True)
    sAB = jnp.sum(gA * gB, axis=(0, 1), keepdims=True)
    sB = jnp.sum(gB * gB, axis=(0, 1), keepdims=True)

    rows = lax.broadcasted_iota(jnp.int32, (8, 128), 0)
    parts_ref[...] = (jnp.where(rows == 0, cnt, 0.0)
                      + jnp.where(rows == 1, sA, 0.0)
                      + jnp.where(rows == 2, sAB, 0.0)
                      + jnp.where(rows == 3, sB, 0.0)).astype(jnp.float32)


def _solver_kernel(n_grad, cd,
                   x_ref, y_ref, m_ref, v_ref,
                   wbig_ref, bg_ref, wout_ref, cobs_ref,
                   wr2_ref, wo2_ref, a_ref,
                   x_out_ref, hid_out_ref, cel_out_ref, parts_ref):
    x0 = x_ref[...]
    y = y_ref[...]
    m = m_ref[...]
    v = v_ref[...]                       # (1, TN)
    Wbig = wbig_ref[...]                 # (4*LH, 2*R+LH) fused [Wgx@GRng | Wgx | Wgh], cd
    bgv = bg_ref[...]                    # (4*LH, 1) bias (broadcasts in the add), f32
    Wout = wout_ref[...]                 # (R, LH) output conv, pre-scaled by 1/n_grad, cd
    A = a_ref[...]                       # (R, R)  I - Wphi  (final var-cost only)
    wr2 = wr2_ref[...]                   # (R, 1)
    wo2 = wo2_ref[...]                   # (R, 1)

    R, TN = x0.shape
    LH = Wout.shape[1]

    # ---- loop-invariant per-tile prep ----
    y_s = jnp.where(jnp.isnan(y), jnp.float32(0.0), y)
    cm = cobs_ref[...] * m * m           # obs-grad coeff (1/normgrad, 1/d_obs already folded)

    def step(carry):
        xk, hid, cel = carry             # xk f32 ; hid/cel in compute dtype `cd`
        obs = cm * (xk - y_s)
        # stack [x ; cm*(x - y) ; hid] -> single fused MXU contraction (K = 2R+LH)
        s = jnp.concatenate([xk, obs, hid.astype(jnp.float32)], axis=0).astype(cd)
        gates = jnp.dot(Wbig, s, preferred_element_type=jnp.float32) + bgv
        # sigmoid rows of Wbig/bg are pre-scaled by 0.5 -> one tanh pass for all gates
        t = jnp.tanh(gates.astype(cd))
        i_g = 0.5 + 0.5 * t[0 * LH:1 * LH, :]
        f_g = 0.5 + 0.5 * t[1 * LH:2 * LH, :]
        o_g = 0.5 + 0.5 * t[2 * LH:3 * LH, :]
        c_g = t[3 * LH:4 * LH, :]
        cel = f_g * cel + i_g * c_g
        hid = o_g * jnp.tanh(cel)
        xk = xk - jnp.dot(Wout, hid, preferred_element_type=jnp.float32)
        return xk, hid, cel

    carry = (x0, jnp.zeros((LH, TN), cd), jnp.zeros((LH, TN), cd))
    # fori_loop bounds the live ranges of the (4*LH, TN) intermediates per iteration
    carry = lax.fori_loop(0, n_grad - 1, lambda _, c: step(c), carry)
    xk, hid, cel = carry

    # var-cost partials for the state entering the LAST step (what PyTorch solve returns)
    dy = (xk - y) * m
    dy2 = jnp.where(jnp.isnan(dy), jnp.float32(0.0), dy * dy) * v     # nansum semantics
    dx = jnp.dot(A, xk, preferred_element_type=jnp.float32)
    dx2 = dx * dx * v
    preg = jnp.sum(wr2 * jnp.sum(dx2, axis=1, keepdims=True), axis=(0, 1), keepdims=True)
    pobs = jnp.sum(wo2 * jnp.sum(dy2, axis=1, keepdims=True), axis=(0, 1), keepdims=True)

    xk, hid, cel = step((xk, hid, cel))

    x_out_ref[...] = xk
    hid_out_ref[...] = hid.astype(jnp.float32)
    cel_out_ref[...] = cel.astype(jnp.float32)
    rows = lax.broadcasted_iota(jnp.int32, (8, 128), 0)
    parts_ref[...] = (jnp.where(rows == 0, preg, 0.0)
                      + jnp.where(rows == 1, pobs, 0.0)).astype(jnp.float32)


def _pick_compute_dtype():
    """bf16 elementwise / matmul-operand math on chips with bf16 VPU/EUP (v6e / v7x);
    f32 on v5e and older (no bf16 VALU/EUP -> casts would only add work)."""
    try:
        kind = jax.devices()[0].device_kind.lower()
    except Exception:
        return jnp.float32
    if "v6" in kind or "v7" in kind:
        return jnp.bfloat16
    return jnp.float32


def init_params(key, C, L):
    k1, k2, k3, k4 = jax.random.split(key, 4)
    scale = jnp.float32(0.1)
    return dict(
        Wphi=scale * jax.random.normal(k1, (C, C), jnp.float32),
        Wgx=scale * jax.random.normal(k2, (4 * L, C), jnp.float32),
        Wgh=scale * jax.random.normal(k3, (4 * L, L), jnp.float32),
        bg=jnp.zeros((4 * L, 1), jnp.float32),
        Wout=scale * jax.random.normal(k4, (C, L), jnp.float32),
        WReg=jnp.ones((C, 1), jnp.float32),
        WObs=jnp.ones((C, 1), jnp.float32),
        alphaReg=jnp.full((1, 1), 0.9, jnp.float32),
        alphaObs=jnp.full((1, 1), 0.1, jnp.float32),
    )


def solver_grad_4dvarnn_forward(x, yobs, mask, params, n_grad=3, eps_solver=0.0):
    """Mirrors Solver_Grad_4DVarNN.forward(x, yobs, mask) for the default entry path
    (hidden=None, cell=None, normgrad=0.0); normgrad is computed at x_0 and held fixed,
    exactly as the PyTorch solver_step does when called from solve()."""
    # TODO(synk): warm-started hidden/cell/normgrad arguments are not plumbed through;
    # only the default (None, None, 0.0) path of the PyTorch forward is reproduced.
    f32 = jnp.float32
    B, C, H, W = x.shape
    HW = H * W
    N = B * HW
    L = params["Wgh"].shape[1]
    n_grad = int(n_grad)
    cd = _pick_compute_dtype()

    # ---- zero-copy sublane fold: (B,C,H,W) -> (G*C, HW/F),  G = B*F channel-groups ----
    # row index = (b*F + f)*C + c, so every per-channel CxC weight becomes kron(I_G, W).
    F = 1
    while (B * C * F) % 8 != 0 and F < 8:
        F += 1
    if (B * C * F) % 8 != 0 or HW % F != 0:
        F = 1            # rare fallback: full-dim (legal, just sublane-sparse) blocks
    G = B * F
    R = C * G            # state rows
    LH = L * G           # ConvLSTM hidden rows
    P = HW // F          # lane (pixel) extent

    def to_fold(a):
        a4 = a.astype(f32).reshape(B, C, F, P)
        return a4.transpose(0, 2, 1, 3).reshape(R, P)       # free when F == 1

    def from_fold(a2, ch):
        return a2.reshape(B, F, ch, P).transpose(0, 2, 1, 3).reshape(B, ch, H, W)

    x2, y2, m2 = to_fold(x), to_fold(yobs), to_fold(mask)

    # ---- lane tiling: pad so there are always >= 2 lane-dense tiles ----
    if P >= 2048:
        TN = 1024        # <= 1024 keeps the v7x (64 MiB/TC) budget comfortable
    elif P >= 1024:
        TN = 512
    elif P >= 512:
        TN = 256
    else:
        TN = 128
    Ppad = max(2 * TN, pl.cdiv(P, TN) * TN)
    T = Ppad // TN
    if Ppad > P:
        pad = ((0, 0), (0, Ppad - P))
        x2, y2, m2 = jnp.pad(x2, pad), jnp.pad(y2, pad), jnp.pad(m2, pad)
    valid = (jnp.arange(Ppad, dtype=jnp.int32) < P).astype(f32).reshape(1, Ppad)

    # bigger tile for the streaming prologue (amortize the ~0.35us/step grid overhead)
    mpro = 1
    for cand in (8, 4, 2):
        if T % cand == 0 and TN * cand <= 8192:
            mpro = cand
            break
    TNp, Tp = TN * mpro, T // mpro

    # ---- trace-time weight folding (tiny matrices only) ----
    eyeG = jnp.eye(G, dtype=f32)
    kg = lambda M: jnp.kron(eyeG, M.astype(f32))             # per-group block-diagonal

    def fold_gates(M):        # (4L, cols) -> (4*LH, G*cols): gate-major, group-minor rows
        return jnp.concatenate([kg(M[q * L:(q + 1) * L, :]) for q in range(4)], axis=0)

    def fold_gate_bias(b):    # (4L, 1) -> (4*LH, 1)
        return jnp.concatenate([jnp.tile(b[q * L:(q + 1) * L, :].astype(f32), (G, 1))
                                for q in range(4)], axis=0)

    tile_ch = lambda w: jnp.tile(w.astype(f32).reshape(C, 1), (G, 1))   # (C,1) -> (R,1)

    Wphi_g = kg(params["Wphi"])
    A_g = jnp.eye(R, dtype=f32) - Wphi_g                     # dx = A_g @ x
    Wgx_g = fold_gates(params["Wgx"])
    Wgh_g = fold_gates(params["Wgh"])
    bg_g = fold_gate_bias(params["bg"])
    Wout_g = kg(params["Wout"]) * f32(1.0 / n_grad)          # 1/n_grad folded in
    wr2 = tile_ch(params["WReg"]) ** 2
    wo2 = tile_ch(params["WObs"]) ** 2
    ar2 = params["alphaReg"].astype(f32).reshape(()) ** 2
    ao2 = params["alphaObs"].astype(f32).reshape(()) ** 2

    # closed-form var-cost gradient prefactors (phi_r / model_H are linear in x):
    #   grad = GA @ x / d_reg  +  cB * mask^2 * (x - y) / d_obs
    GA = (2.0 * ar2) * (A_g.T @ jnp.diag(wr2[:, 0]) @ A_g)
    cB = (2.0 * ao2) * wo2

    dspec = lambda tn: pl.BlockSpec((R, tn), lambda i: (0, i))
    vspec = lambda tn: pl.BlockSpec((1, tn), lambda i: (0, i))
    hspec = pl.BlockSpec((LH, TN), lambda i: (0, i))
    pspec = pl.BlockSpec((8, 128), lambda i: (i, 0))
    wspec = lambda shape: pl.BlockSpec(shape, lambda i: (0, 0))

    cparams = pltpu.CompilerParams(
        dimension_semantics=("parallel",),
        vmem_limit_bytes=40 * 2**20,        # safe on v5e/v6e (128 MiB) and v7x (64 MiB/TC)
    )

    # ---- phase 1: global reductions needed before the loop (d_obs, normgrad) ----
    parts0 = pl.pallas_call(
        _prologue_kernel,
        grid=(Tp,),
        in_specs=[dspec(TNp), dspec(TNp), dspec(TNp), vspec(TNp),
                  wspec((R, R)), wspec((R, 1))],
        out_specs=pl.BlockSpec((8, 128), lambda i: (i, 0)),
        out_shape=jax.ShapeDtypeStruct((Tp * 8, 128), jnp.float32),
        compiler_params=cparams,
    )(x2, y2, m2, valid, GA, cB)

    cnt = jnp.sum(parts0[0::8, 0])
    sA = jnp.sum(parts0[1::8, 0])
    sAB = jnp.sum(parts0[2::8, 0])
    sB = jnp.sum(parts0[3::8, 0])
    d_obs = cnt / f32(C)                    # nansum divisor of Model_WeightedL2Norm
    d_reg = f32(N)                          # dx = x - phi(x) has no NaN for finite x
    mean_g2 = (sA / (d_reg * d_reg) + 2.0 * sAB / (d_reg * d_obs)
               + sB / (d_obs * d_obs)) / f32(C * N)
    normgrad = jnp.sqrt(mean_g2 + f32(eps_solver))
    inv_ng = 1.0 / normgrad

    # fold the data-dependent scalars into the tiny matrices -> no divides in the loop
    GRng = GA * (inv_ng / d_reg)            # (R, R)  reg part of the normalized gradient
    cobs_ng = cB * (inv_ng / d_obs)         # (R, 1)  obs part of the normalized gradient

    # fused gate matmul  gates = [Wgx@GRng | Wgx | Wgh] @ [x ; cm*(x-y) ; hid] + bg ;
    # sigmoid(z) = 0.5*(1+tanh(z/2)): fold the 0.5 into the sigmoid rows (weights + bias).
    Wbig = jnp.concatenate([Wgx_g @ GRng, Wgx_g, Wgh_g], axis=1)       # (4*LH, 2*R+LH)
    gscale = jnp.concatenate([jnp.full((3 * LH, 1), 0.5, f32),
                              jnp.ones((LH, 1), f32)], axis=0)
    Wbig = (Wbig * gscale).astype(cd)
    bg_s = bg_g * gscale
    Wout_cd = Wout_g.astype(cd)

    # ---- phase 2: the n_grad fixed-point loop, pixel-tiled and core-parallel ----
    out_shape = (
        jax.ShapeDtypeStruct((R, Ppad), jnp.float32),       # x_{k+1}
        jax.ShapeDtypeStruct((LH, Ppad), jnp.float32),      # hidden
        jax.ShapeDtypeStruct((LH, Ppad), jnp.float32),      # cell
        jax.ShapeDtypeStruct((T * 8, 128), jnp.float32),    # per-tile var-cost partials
    )
    x_f, hid_f, cel_f, lparts = pl.pallas_call(
        functools.partial(_solver_kernel, n_grad, cd),
        grid=(T,),
        in_specs=[dspec(TN), dspec(TN), dspec(TN), vspec(TN),
                  wspec(Wbig.shape), wspec((4 * LH, 1)), wspec((R, LH)),
                  wspec((R, 1)), wspec((R, 1)), wspec((R, 1)), wspec((R, R))],
        out_specs=(dspec(TN), hspec, hspec, pspec),
        out_shape=out_shape,
        compiler_params=cparams,
    )(x2, y2, m2, valid, Wbig, bg_s, Wout_cd, cobs_ng, wr2, wo2, A_g)

    loss = (ar2 * jnp.sum(lparts[0::8, 0]) / d_reg
            + ao2 * jnp.sum(lparts[1::8, 0]) / d_obs)

    x_out = from_fold(x_f[:, :P], C)
    hidden = from_fold(hid_f[:, :P], L)
    cell = from_fold(cel_f[:, :P], L)
    var_cost = loss.reshape((1,))                     # like alphaReg**2 * norm(...) (shape (1,))
    alpha_reg = params["alphaReg"].reshape((1,))
    alpha_obs = params["alphaObs"]                    # (DimObs, 1) = (1, 1)
    return x_out, hidden, cell, normgrad, var_cost, alpha_reg, alpha_obs


if __name__ == "__main__":
    B, C, H, W = 2, 4, 16, 16
    L = 16            # ConvLSTM hidden dim (multiple of 8 for sublane-aligned gate slices)
    n_grad = 3

    key = jax.random.PRNGKey(0)
    kx, ky, km, kp = jax.random.split(key, 4)
    x = jax.random.normal(kx, (B, C, H, W), jnp.float32)
    yobs = jax.random.normal(ky, (B, C, H, W), jnp.float32)
    mask = (jax.random.uniform(km, (B, C, H, W)) > 0.5).astype(jnp.float32)
    params = init_params(kp, C, L)

    fwd = jax.jit(functools.partial(solver_grad_4dvarnn_forward,
                                    n_grad=n_grad, eps_solver=0.0))
    outs = fwd(x, yobs, mask, params)
    outs = jax.block_until_ready(outs)
    print("KERNEL_OK")
</pallas_src>

<mosaic_0001>
module attributes {stable_mosaic.version = 11 : i64} {
  func.func @_prologue_kernel(%arg0: i32, %arg1: memref<8x256xf32, #tpu.memory_space<vmem>>, %arg2: memref<8x256xf32, #tpu.memory_space<vmem>>, %arg3: memref<8x256xf32, #tpu.memory_space<vmem>>, %arg4: memref<1x256xf32, #tpu.memory_space<vmem>>, %arg5: memref<8x8xf32, #tpu.memory_space<vmem>>, %arg6: memref<8x1xf32, #tpu.memory_space<vmem>>, %arg7: memref<8x128xf32, #tpu.memory_space<vmem>>) attributes {dimension_semantics = [#tpu.dimension_semantics<parallel>], iteration_bounds = array<i64: 1>, scalar_prefetch = 0 : i64, scratch_operands = 0 : i64, tpu.core_type = #tpu.core_type<tc>, window_params = [{transform_indices = @transform_0, window_bounds = array<i64: 8, 256>}, {transform_indices = @transform_1, window_bounds = array<i64: 8, 256>}, {transform_indices = @transform_2, window_bounds = array<i64: 8, 256>}, {transform_indices = @transform_3, window_bounds = array<i64: 1, 256>}, {pipeline_mode = #tpu.pipeline_mode<synchronous>, transform_indices = @transform_4, window_bounds = array<i64: 8, 8>}, {pipeline_mode = #tpu.pipeline_mode<synchronous>, transform_indices = @transform_5, window_bounds = array<i64: 8, 1>}, {transform_indices = @transform_6, window_bounds = array<i64: 8, 128>}]} {
    %c0 = arith.constant 0 : index
    %c0_0 = arith.constant 0 : index
    %0 = vector.load %arg1[%c0, %c0_0] : memref<8x256xf32, #tpu.memory_space<vmem>>, vector<8x256xf32>
    %c0_1 = arith.constant 0 : index
    %c0_2 = arith.constant 0 : index
    %1 = vector.load %arg2[%c0_1, %c0_2] : memref<8x256xf32, #tpu.memory_space<vmem>>, vector<8x256xf32>
    %c0_3 = arith.constant 0 : index
    %c0_4 = arith.constant 0 : index
    %2 = vector.load %arg3[%c0_3, %c0_4] : memref<8x256xf32, #tpu.memory_space<vmem>>, vector<8x256xf32>
    %c0_5 = arith.constant 0 : index
    %c0_6 = arith.constant 0 : index
    %3 = vector.load %arg4[%c0_5, %c0_6] : memref<1x256xf32, #tpu.memory_space<vmem>>, vector<1x256xf32>
    %4 = arith.subf %0, %1 : vector<8x256xf32>
    %5 = arith.mulf %4, %2 : vector<8x256xf32>
    %6 = arith.cmpf one, %5, %5 : vector<8x256xf32>
    %cst = arith.constant dense<true> : vector<8x256xi1>
    %7 = arith.xori %6, %cst : vector<8x256xi1>
    %8 = arith.extui %7 : vector<8x256xi1> to vector<8x256xi32>
    %9 = arith.sitofp %8 : vector<8x256xi32> to vector<8x256xf32>
    %10 = vector.broadcast %3 : vector<1x256xf32> to vector<8x256xf32>
    %11 = arith.mulf %9, %10 : vector<8x256xf32>
    %12 = vector.shape_cast %11 : vector<8x256xf32> to vector<1x8x256xf32>
    %cst_7 = arith.constant dense<0.000000e+00> : vector<1xf32>
    %13 = vector.multi_reduction <add>, %12, %cst_7 [1, 2] : vector<1x8x256xf32> to vector<1xf32>
    %14 = vector.shape_cast %13 : vector<1xf32> to vector<1x1x1xf32>
    %15 = vector.extract %14[0, 0, 0] : f32 from vector<1x1x1xf32>
    %16 = vector.broadcast %15 : f32 to vector<1x1xf32>
    %17 = arith.cmpf one, %1, %1 : vector<8x256xf32>
    %cst_8 = arith.constant 0.000000e+00 : f32
    %18 = vector.broadcast %cst_8 : f32 to vector<8x256xf32>
    %19 = arith.select %17, %18, %1 : vector<8x256xi1>, vector<8x256xf32>
    %c0_9 = arith.constant 0 : index
    %c0_10 = arith.constant 0 : index
    %20 = vector.load %arg5[%c0_9, %c0_10] : memref<8x8xf32, #tpu.memory_space<vmem>>, vector<8x8xf32>
    %cst_11 = arith.constant dense<0.000000e+00> : vector<8x256xf32>
    %21 = tpu.matmul %20, %0, %cst_11 {dimension_numbers = #tpu.dot_dimension_numbers<[1], [0], [0], [1], [0, 0, 1, 1], [], []>} : vector<8x8xf32>, vector<8x256xf32>, vector<8x256xf32> -> vector<8x256xf32>
    %22 = vector.broadcast %3 : vector<1x256xf32> to vector<8x256xf32>
    %23 = arith.mulf %21, %22 : vector<8x256xf32>
    %c0_12 = arith.constant 0 : index
    %c0_13 = arith.constant 0 : index
    %24 = vector.load %arg6[%c0_12, %c0_13] : memref<8x1xf32, #tpu.memory_space<vmem>>, vector<8x1xf32>
    %25 = arith.subf %0, %19 : vector<8x256xf32>
    %26 = vector.broadcast %24 : vector<8x1xf32> to vector<8x256xf32>
    %27 = arith.mulf %26, %25 : vector<8x256xf32>
    %28 = arith.mulf %27, %2 : vector<8x256xf32>
    %29 = arith.mulf %28, %2 : vector<8x256xf32>
    %30 = vector.broadcast %3 : vector<1x256xf32> to vector<8x256xf32>
    %31 = arith.mulf %29, %30 : vector<8x256xf32>
    %32 = arith.mulf %23, %23 : vector<8x256xf32>
    %33 = vector.shape_cast %32 : vector<8x256xf32> to vector<1x8x256xf32>
    %cst_14 = arith.constant dense<0.000000e+00> : vector<1xf32>
    %34 = vector.multi_reduction <add>, %33, %cst_14 [1, 2] : vector<1x8x256xf32> to vector<1xf32>
    %35 = vector.shape_cast %34 : vector<1xf32> to vector<1x1x1xf32>
    %36 = vector.extract %35[0, 0, 0] : f32 from vector<1x1x1xf32>
    %37 = vector.broadcast %36 : f32 to vector<1x1xf32>
    %38 = arith.mulf %23, %31 : vector<8x256xf32>
    %39 = vector.shape_cast %38 : vector<8x256xf32> to vector<1x8x256xf32>
    %cst_15 = arith.constant dense<0.000000e+00> : vector<1xf32>
    %40 = vector.multi_reduction <add>, %39, %cst_15 [1, 2] : vector<1x8x256xf32> to vector<1xf32>
    %41 = vector.shape_cast %40 : vector<1xf32> to vector<1x1x1xf32>
    %42 = vector.extract %41[0, 0, 0] : f32 from vector<1x1x1xf32>
    %43 = vector.broadcast %42 : f32 to vector<1x1xf32>
    %44 = arith.mulf %31, %31 : vector<8x256xf32>
    %45 = vector.shape_cast %44 : vector<8x256xf32> to vector<1x8x256xf32>
    %cst_16 = arith.constant dense<0.000000e+00> : vector<1xf32>
    %46 = vector.multi_reduction <add>, %45, %cst_16 [1, 2] : vector<1x8x256xf32> to vector<1xf32>
    %47 = vector.shape_cast %46 : vector<1xf32> to vector<1x1x1xf32>
    %48 = vector.extract %47[0, 0, 0] : f32 from vector<1x1x1xf32>
    %49 = vector.broadcast %48 : f32 to vector<1x1xf32>
    %50 = tpu.iota {dimensions = array<i32: 0>} : vector<8x128xi32>
    %c0_i32 = arith.constant 0 : i32
    %51 = vector.broadcast %c0_i32 : i32 to vector<8x128xi32>
    %52 = arith.cmpi eq, %50, %51 : vector<8x128xi32>
    %cst_17 = arith.constant 0.000000e+00 : f32
    %53 = vector.shape_cast %16 : vector<1x1xf32> to vector<1x1xf32>
    %54 = vector.broadcast %53 : vector<1x1xf32> to vector<8x128xf32>
    %55 = vector.broadcast %cst_17 : f32 to vector<8x128xf32>
    %56 = arith.select %52, %54, %55 : vector<8x128xi1>, vector<8x128xf32>
    %c1_i32 = arith.constant 1 : i32
    %57 = vector.broadcast %c1_i32 : i32 to vector<8x128xi32>
    %58 = arith.cmpi eq, %50, %57 : vector<8x128xi32>
    %cst_18 = arith.constant 0.000000e+00 : f32
    %59 = vector.shape_cast %37 : vector<1x1xf32> to vector<1x1xf32>
    %60 = vector.broadcast %59 : vector<1x1xf32> to vector<8x128xf32>
    %61 = vector.broadcast %cst_18 : f32 to vector<8x128xf32>
    %62 = arith.select %58, %60, %61 : vector<8x128xi1>, vector<8x128xf32>
    %63 = arith.addf %56, %62 : vector<8x128xf32>
    %c2_i32 = arith.constant 2 : i32
    %64 = vector.broadcast %c2_i32 : i32 to vector<8x128xi32>
    %65 = arith.cmpi eq, %50, %64 : vector<8x128xi32>
    %cst_19 = arith.constant 0.000000e+00 : f32
    %66 = vector.shape_cast %43 : vector<1x1xf32> to vector<1x1xf32>
    %67 = vector.broadcast %66 : vector<1x1xf32> to vector<8x128xf32>
    %68 = vector.broadcast %cst_19 : f32 to vector<8x128xf32>
    %69 = arith.select %65, %67, %68 : vector<8x128xi1>, vector<8x128xf32>
    %70 = arith.addf %63, %69 : vector<8x128xf32>
    %c3_i32 = arith.constant 3 : i32
    %71 = vector.broadcast %c3_i32 : i32 to vector<8x128xi32>
    %72 = arith.cmpi eq, %50, %71 : vector<8x128xi32>
    %cst_20 = arith.constant 0.000000e+00 : f32
    %73 = vector.shape_cast %49 : vector<1x1xf32> to vector<1x1xf32>
    %74 = vector.broadcast %73 : vector<1x1xf32> to vector<8x128xf32>
    %75 = vector.broadcast %cst_20 : f32 to vector<8x128xf32>
    %76 = arith.select %72, %74, %75 : vector<8x128xi1>, vector<8x128xf32>
    %77 = arith.addf %70, %76 : vector<8x128xf32>
    %c0_21 = arith.constant 0 : index
    %c0_22 = arith.constant 0 : index
    %78 = vector.load %arg7[%c0_21, %c0_22] : memref<8x128xf32, #tpu.memory_space<vmem>>, vector<8x128xf32>
    tpu.vector_store %arg7[%c0_21, %c0_22], %77 {strides = array<i32>} : memref<8x128xf32, #tpu.memory_space<vmem>>, vector<8x128xf32>,
    return
  }
  func.func @transform_0(%arg0: i32) -> (i32, i32) {
    %c0_i32 = arith.constant 0 : i32
    %c0_i32_0 = arith.constant 0 : i32
    return %c0_i32, %arg0 : i32, i32
  }
  func.func @transform_1(%arg0: i32) -> (i32, i32) {
    %c0_i32 = arith.constant 0 : i32
    %c0_i32_0 = arith.constant 0 : i32
    return %c0_i32, %arg0 : i32, i32
  }
  func.func @transform_2(%arg0: i32) -> (i32, i32) {
    %c0_i32 = arith.constant 0 : i32
    %c0_i32_0 = arith.constant 0 : i32
    return %c0_i32, %arg0 : i32, i32
  }
  func.func @transform_3(%arg0: i32) -> (i32, i32) {
    %c0_i32 = arith.constant 0 : i32
    %c0_i32_0 = arith.constant 0 : i32
    return %c0_i32, %arg0 : i32, i32
  }
  func.func @transform_4(%arg0: i32) -> (i32, i32) {
    %c0_i32 = arith.constant 0 : i32
    %c0_i32_0 = arith.constant 0 : i32
    %c0_i32_1 = arith.constant 0 : i32
    return %c0_i32, %c0_i32_0 : i32, i32
  }
  func.func @transform_5(%arg0: i32) -> (i32, i32) {
    %c0_i32 = arith.constant 0 : i32
    %c0_i32_0 = arith.constant 0 : i32
    %c0_i32_1 = arith.constant 0 : i32
    return %c0_i32, %c0_i32_0 : i32, i32
  }
  func.func @transform_6(%arg0: i32) -> (i32, i32) {
    %c0_i32 = arith.constant 0 : i32
    %c0_i32_0 = arith.constant 0 : i32
    return %arg0, %c0_i32 : i32, i32
  }
}

module attributes {stable_mosaic.version = 11 : i64} {
  func.func @_solver_kernel(%arg0: i32, %arg1: memref<8x128xf32, #tpu.memory_space<vmem>>, %arg2: memref<8x128xf32, #tpu.memory_space<vmem>>, %arg3: memref<8x128xf32, #tpu.memory_space<vmem>>, %arg4: memref<1x128xf32, #tpu.memory_space<vmem>>, %arg5: memref<128x48xf32, #tpu.memory_space<vmem>>, %arg6: memref<128x1xf32, #tpu.memory_space<vmem>>, %arg7: memref<8x32xf32, #tpu.memory_space<vmem>>, %arg8: memref<8x1xf32, #tpu.memory_space<vmem>>, %arg9: memref<8x1xf32, #tpu.memory_space<vmem>>, %arg10: memref<8x1xf32, #tpu.memory_space<vmem>>, %arg11: memref<8x8xf32, #tpu.memory_space<vmem>>, %arg12: memref<8x128xf32, #tpu.memory_space<vmem>>, %arg13: memref<32x128xf32, #tpu.memory_space<vmem>>, %arg14: memref<32x128xf32, #tpu.memory_space<vmem>>, %arg15: memref<8x128xf32, #tpu.memory_space<vmem>>) attributes {dimension_semantics = [#tpu.dimension_semantics<parallel>], iteration_bounds = array<i64: 2>, scalar_prefetch = 0 : i64, scratch_operands = 0 : i64, tpu.core_type = #tpu.core_type<tc>, window_params = [{transform_indices = @transform_0, window_bounds = array<i64: 8, 128>}, {transform_indices = @transform_1, window_bounds = array<i64: 8, 128>}, {transform_indices = @transform_2, window_bounds = array<i64: 8, 128>}, {transform_indices = @transform_3, window_bounds = array<i64: 1, 128>}, {pipeline_mode = #tpu.pipeline_mode<synchronous>, transform_indices = @transform_4, window_bounds = array<i64: 128, 48>}, {pipeline_mode = #tpu.pipeline_mode<synchronous>, transform_indices = @transform_5, window_bounds = array<i64: 128, 1>}, {pipeline_mode = #tpu.pipeline_mode<synchronous>, transform_indices = @transform_6, window_bounds = array<i64: 8, 32>}, {pipeline_mode = #tpu.pipeline_mode<synchronous>, transform_indices = @transform_7, window_bounds = array<i64: 8, 1>}, {pipeline_mode = #tpu.pipeline_mode<synchronous>, transform_indices = @transform_8, window_bounds = array<i64: 8, 1>}, {pipeline_mode = #tpu.pipeline_mode<synchronous>, transform_indices = @transform_9, window_bounds = array<i64: 8, 1>}, {pipeline_mode = #tpu.pipeline_mode<synchronous>, transform_indices = @transform_10, window_bounds = array<i64: 8, 8>}, {transform_indices = @transform_11, window_bounds = array<i64: 8, 128>}, {transform_indices = @transform_12, window_bounds = array<i64: 32, 128>}, {transform_indices = @transform_13, window_bounds = array<i64: 32, 128>}, {transform_indices = @transform_14, window_bounds = array<i64: 8, 128>}]} {
    %c0 = arith.constant 0 : index
    %c0_0 = arith.constant 0 : index
    %0 = vector.load %arg1[%c0, %c0_0] : memref<8x128xf32, #tpu.memory_space<vmem>>, vector<8x128xf32>
    %c0_1 = arith.constant 0 : index
    %c0_2 = arith.constant 0 : index
    %1 = vector.load %arg2[%c0_1, %c0_2] : memref<8x128xf32, #tpu.memory_space<vmem>>, vector<8x128xf32>
    %c0_3 = arith.constant 0 : index
    %c0_4 = arith.constant 0 : index
    %2 = vector.load %arg3[%c0_3, %c0_4] : memref<8x128xf32, #tpu.memory_space<vmem>>, vector<8x128xf32>
    %c0_5 = arith.constant 0 : index
    %c0_6 = arith.constant 0 : index
    %3 = vector.load %arg4[%c0_5, %c0_6] : memref<1x128xf32, #tpu.memory_space<vmem>>, vector<1x128xf32>
    %c0_7 = arith.constant 0 : index
    %c0_8 = arith.constant 0 : index
    %4 = vector.load %arg5[%c0_7, %c0_8] : memref<128x48xf32, #tpu.memory_space<vmem>>, vector<128x48xf32>
    %c0_9 = arith.constant 0 : index
    %c0_10 = arith.constant 0 : index
    %5 = vector.load %arg6[%c0_9, %c0_10] : memref<128x1xf32, #tpu.memory_space<vmem>>, vector<128x1xf32>
    %c0_11 = arith.constant 0 : index
    %c0_12 = arith.constant 0 : index
    %6 = vector.load %arg7[%c0_11, %c0_12] : memref<8x32xf32, #tpu.memory_space<vmem>>, vector<8x32xf32>
    %c0_13 = arith.constant 0 : index
    %c0_14 = arith.constant 0 : index
    %7 = vector.load %arg11[%c0_13, %c0_14] : memref<8x8xf32, #tpu.memory_space<vmem>>, vector<8x8xf32>
    %c0_15 = arith.constant 0 : index
    %c0_16 = arith.constant 0 : index
    %8 = vector.load %arg9[%c0_15, %c0_16] : memref<8x1xf32, #tpu.memory_space<vmem>>, vector<8x1xf32>
    %c0_17 = arith.constant 0 : index
    %c0_18 = arith.constant 0 : index
    %9 = vector.load %arg10[%c0_17, %c0_18] : memref<8x1xf32, #tpu.memory_space<vmem>>, vector<8x1xf32>
    %10 = arith.cmpf one, %1, %1 : vector<8x128xf32>
    %cst = arith.constant 0.000000e+00 : f32
    %11 = vector.broadcast %cst : f32 to vector<8x128xf32>
    %12 = arith.select %10, %11, %1 : vector<8x128xi1>, vector<8x128xf32>
    %c0_19 = arith.constant 0 : index
    %c0_20 = arith.constant 0 : index
    %13 = vector.load %arg8[%c0_19, %c0_20] : memref<8x1xf32, #tpu.memory_space<vmem>>, vector<8x1xf32>
    %14 = vector.broadcast %13 : vector<8x1xf32> to vector<8x128xf32>
    %15 = arith.mulf %14, %2 : vector<8x128xf32>
    %16 = arith.mulf %15, %2 : vector<8x128xf32>
    %cst_21 = arith.constant 0.000000e+00 : f32
    %17 = vector.broadcast %cst_21 : f32 to vector<32x128xf32>
    %cst_22 = arith.constant 0.000000e+00 : f32
    %18 = vector.broadcast %cst_22 : f32 to vector<32x128xf32>
    %c0_i32 = arith.constant 0 : i32
    %c2_i32 = arith.constant 2 : i32
    %19 = arith.addi %c0_i32, %c2_i32 : i32
    %c1_i32 = arith.constant 1 : i32
    %20:3 = scf.for %arg16 = %c0_i32 to %19 step %c1_i32 iter_args(%arg17 = %0, %arg18 = %17, %arg19 = %18) -> (vector<8x128xf32>, vector<32x128xf32>, vector<32x128xf32>)  : i32 {
      %97 = arith.subf %arg17, %12 : vector<8x128xf32>
      %98 = arith.mulf %16, %97 : vector<8x128xf32>
      %99 = tpu.concatenate %arg17, %98, %arg18 in 0 : vector<8x128xf32>, vector<8x128xf32>, vector<32x128xf32> -> vector<48x128xf32>
      %cst_49 = arith.constant dense<0.000000e+00> : vector<128x128xf32>
      %100 = tpu.matmul %4, %99, %cst_49 {dimension_numbers = #tpu.dot_dimension_numbers<[1], [0], [0], [1], [0, 0, 1, 1], [], []>} : vector<128x48xf32>, vector<48x128xf32>, vector<128x128xf32> -> vector<128x128xf32>
      %101 = vector.broadcast %5 : vector<128x1xf32> to vector<128x128xf32>
      %102 = arith.addf %100, %101 : vector<128x128xf32>
      %103 = math.tanh %102 : vector<128x128xf32>
      %104 = vector.extract_strided_slice %103 {offsets = [0, 0], sizes = [32, 128], strides = [1, 1]} : vector<128x128xf32> to vector<32x128xf32>
      %cst_50 = arith.constant 5.000000e-01 : f32
      %105 = vector.broadcast %cst_50 : f32 to vector<32x128xf32>
      %106 = arith.mulf %105, %104 : vector<32x128xf32>
      %cst_51 = arith.constant 5.000000e-01 : f32
      %107 = vector.broadcast %cst_51 : f32 to vector<32x128xf32>
      %108 = arith.addf %107, %106 : vector<32x128xf32>
      %109 = vector.extract_strided_slice %103 {offsets = [32, 0], sizes = [32, 128], strides = [1, 1]} : vector<128x128xf32> to vector<32x128xf32>
      %cst_52 = arith.constant 5.000000e-01 : f32
      %110 = vector.broadcast %cst_52 : f32 to vector<32x128xf32>
      %111 = arith.mulf %110, %109 : vector<32x128xf32>
      %cst_53 = arith.constant 5.000000e-01 : f32
      %112 = vector.broadcast %cst_53 : f32 to vector<32x128xf32>
      %113 = arith.addf %112, %111 : vector<32x128xf32>
      %114 = vector.extract_strided_slice %103 {offsets = [64, 0], sizes = [32, 128], strides = [1, 1]} : vector<128x128xf32> to vector<32x128xf32>
      %cst_54 = arith.constant 5.000000e-01 : f32
      %115 = vector.broadcast %cst_54 : f32 to vector<32x128xf32>
      %116 = arith.mulf %115, %114 : vector<32x128xf32>
      %cst_55 = arith.constant 5.000000e-01 : f32
      %117 = vector.broadcast %cst_55 : f32 to vector<32x128xf32>
      %118 = arith.addf %117, %116 : vector<32x128xf32>
      %119 = vector.extract_strided_slice %103 {offsets = [96, 0], sizes = [32, 128], strides = [1, 1]} : vector<128x128xf32> to vector<32x128xf32>
      %120 = arith.mulf %113, %arg19 : vector<32x128xf32>
      %121 = arith.mulf %108, %119 : vector<32x128xf32>
      %122 = arith.addf %120, %121 : vector<32x128xf32>
      %123 = math.tanh %122 : vector<32x128xf32>
      %124 = arith.mulf %118, %123 : vector<32x128xf32>
      %cst_56 = arith.constant dense<0.000000e+00> : vector<8x128xf32>
      %125 = tpu.matmul %6, %124, %cst_56 {dimension_numbers = #tpu.dot_dimension_numbers<[1], [0], [0], [1], [0, 0, 1, 1], [], []>} : vector<8x32xf32>, vector<32x128xf32>, vector<8x128xf32> -> vector<8x128xf32>
      %126 = arith.subf %arg17, %125 : vector<8x128xf32>
      scf.yield %126, %124, %122 : vector<8x128xf32>, vector<32x128xf32>, vector<32x128xf32>
    }
    %21 = arith.subf %20#0, %1 : vector<8x128xf32>
    %22 = arith.mulf %21, %2 : vector<8x128xf32>
    %23 = arith.cmpf one, %22, %22 : vector<8x128xf32>
    %24 = arith.mulf %22, %22 : vector<8x128xf32>
    %cst_23 = arith.constant 0.000000e+00 : f32
    %25 = vector.broadcast %cst_23 : f32 to vector<8x128xf32>
    %26 = arith.select %23, %25, %24 : vector<8x128xi1>, vector<8x128xf32>
    %27 = vector.broadcast %3 : vector<1x128xf32> to vector<8x128xf32>
    %28 = arith.mulf %26, %27 : vector<8x128xf32>
    %cst_24 = arith.constant dense<0.000000e+00> : vector<8x128xf32>
    %29 = tpu.matmul %7, %20#0, %cst_24 {dimension_numbers = #tpu.dot_dimension_numbers<[1], [0], [0], [1], [0, 0, 1, 1], [], []>} : vector<8x8xf32>, vector<8x128xf32>, vector<8x128xf32> -> vector<8x128xf32>
    %30 = arith.mulf %29, %29 : vector<8x128xf32>
    %31 = vector.broadcast %3 : vector<1x128xf32> to vector<8x128xf32>
    %32 = arith.mulf %30, %31 : vector<8x128xf32>
    %cst_25 = arith.constant dense<0.000000e+00> : vector<8xf32>
    %33 = vector.multi_reduction <add>, %32, %cst_25 [1] : vector<8x128xf32> to vector<8xf32>
    %34 = vector.shape_cast %33 : vector<8xf32> to vector<8x1xf32>
    %35 = arith.mulf %8, %34 : vector<8x1xf32>
    %36 = vector.shape_cast %35 : vector<8x1xf32> to vector<1x8x1xf32>
    %cst_26 = arith.constant dense<0.000000e+00> : vector<1xf32>
    %37 = vector.multi_reduction <add>, %36, %cst_26 [1, 2] : vector<1x8x1xf32> to vector<1xf32>
    %38 = vector.shape_cast %37 : vector<1xf32> to vector<1x1x1xf32>
    %39 = vector.extract %38[0, 0, 0] : f32 from vector<1x1x1xf32>
    %40 = vector.broadcast %39 : f32 to vector<1x1xf32>
    %cst_27 = arith.constant dense<0.000000e+00> : vector<8xf32>
    %41 = vector.multi_reduction <add>, %28, %cst_27 [1] : vector<8x128xf32> to vector<8xf32>
    %42 = vector.shape_cast %41 : vector<8xf32> to vector<8x1xf32>
    %43 = arith.mulf %9, %42 : vector<8x1xf32>
    %44 = vector.shape_cast %43 : vector<8x1xf32> to vector<1x8x1xf32>
    %cst_28 = arith.constant dense<0.000000e+00> : vector<1xf32>
    %45 = vector.multi_reduction <add>, %44, %cst_28 [1, 2] : vector<1x8x1xf32> to vector<1xf32>
    %46 = vector.shape_cast %45 : vector<1xf32> to vector<1x1x1xf32>
    %47 = vector.extract %46[0, 0, 0] : f32 from vector<1x1x1xf32>
    %48 = vector.broadcast %47 : f32 to vector<1x1xf32>
    %49 = arith.subf %20#0, %12 : vector<8x128xf32>
    %50 = arith.mulf %16, %49 : vector<8x128xf32>
    %51 = tpu.concatenate %20#0, %50, %20#1 in 0 : vector<8x128xf32>, vector<8x128xf32>, vector<32x128xf32> -> vector<48x128xf32>
    %cst_29 = arith.constant dense<0.000000e+00> : vector<128x128xf32>
    %52 = tpu.matmul %4, %51, %cst_29 {dimension_numbers = #tpu.dot_dimension_numbers<[1], [0], [0], [1], [0, 0, 1, 1], [], []>} : vector<128x48xf32>, vector<48x128xf32>, vector<128x128xf32> -> vector<128x128xf32>
    %53 = vector.broadcast %5 : vector<128x1xf32> to vector<128x128xf32>
    %54 = arith.addf %52, %53 : vector<128x128xf32>
    %55 = math.tanh %54 : vector<128x128xf32>
    %56 = vector.extract_strided_slice %55 {offsets = [0, 0], sizes = [32, 128], strides = [1, 1]} : vector<128x128xf32> to vector<32x128xf32>
    %cst_30 = arith.constant 5.000000e-01 : f32
    %57 = vector.broadcast %cst_30 : f32 to vector<32x128xf32>
    %58 = arith.mulf %57, %56 : vector<32x128xf32>
    %cst_31 = arith.constant 5.000000e-01 : f32
    %59 = vector.broadcast %cst_31 : f32 to vector<32x128xf32>
    %60 = arith.addf %59, %58 : vector<32x128xf32>
    %61 = vector.extract_strided_slice %55 {offsets = [32, 0], sizes = [32, 128], strides = [1, 1]} : vector<128x128xf32> to vector<32x128xf32>
    %cst_32 = arith.constant 5.000000e-01 : f32
    %62 = vector.broadcast %cst_32 : f32 to vector<32x128xf32>
    %63 = arith.mulf %62, %61 : vector<32x128xf32>
    %cst_33 = arith.constant 5.000000e-01 : f32
    %64 = vector.broadcast %cst_33 : f32 to vector<32x128xf32>
    %65 = arith.addf %64, %63 : vector<32x128xf32>
    %66 = vector.extract_strided_slice %55 {offsets = [64, 0], sizes = [32, 128], strides = [1, 1]} : vector<128x128xf32> to vector<32x128xf32>
    %cst_34 = arith.constant 5.000000e-01 : f32
    %67 = vector.broadcast %cst_34 : f32 to vector<32x128xf32>
    %68 = arith.mulf %67, %66 : vector<32x128xf32>
    %cst_35 = arith.constant 5.000000e-01 : f32
    %69 = vector.broadcast %cst_35 : f32 to vector<32x128xf32>
    %70 = arith.addf %69, %68 : vector<32x128xf32>
    %71 = vector.extract_strided_slice %55 {offsets = [96, 0], sizes = [32, 128], strides = [1, 1]} : vector<128x128xf32> to vector<32x128xf32>
    %72 = arith.mulf %65, %20#2 : vector<32x128xf32>
    %73 = arith.mulf %60, %71 : vector<32x128xf32>
    %74 = arith.addf %72, %73 : vector<32x128xf32>
    %75 = math.tanh %74 : vector<32x128xf32>
    %76 = arith.mulf %70, %75 : vector<32x128xf32>
    %cst_36 = arith.constant dense<0.000000e+00> : vector<8x128xf32>
    %77 = tpu.matmul %6, %76, %cst_36 {dimension_numbers = #tpu.dot_dimension_numbers<[1], [0], [0], [1], [0, 0, 1, 1], [], []>} : vector<8x32xf32>, vector<32x128xf32>, vector<8x128xf32> -> vector<8x128xf32>
    %78 = arith.subf %20#0, %77 : vector<8x128xf32>
    %c0_37 = arith.constant 0 : index
    %c0_38 = arith.constant 0 : index
    %79 = vector.load %arg12[%c0_37, %c0_38] : memref<8x128xf32, #tpu.memory_space<vmem>>, vector<8x128xf32>
    tpu.vector_store %arg12[%c0_37, %c0_38], %78 {strides = array<i32>} : memref<8x128xf32, #tpu.memory_space<vmem>>, vector<8x128xf32>,
    %c0_39 = arith.constant 0 : index
    %c0_40 = arith.constant 0 : index
    %80 = vector.load %arg13[%c0_39, %c0_40] : memref<32x128xf32, #tpu.memory_space<vmem>>, vector<32x128xf32>
    tpu.vector_store %arg13[%c0_39, %c0_40], %76 {strides = array<i32>} : memref<32x128xf32, #tpu.memory_space<vmem>>, vector<32x128xf32>,
    %c0_41 = arith.constant 0 : index
    %c0_42 = arith.constant 0 : index
    %81 = vector.load %arg14[%c0_41, %c0_42] : memref<32x128xf32, #tpu.memory_space<vmem>>, vector<32x128xf32>
    tpu.vector_store %arg14[%c0_41, %c0_42], %74 {strides = array<i32>} : memref<32x128xf32, #tpu.memory_space<vmem>>, vector<32x128xf32>,
    %82 = tpu.iota {dimensions = array<i32: 0>} : vector<8x128xi32>
    %c0_i32_43 = arith.constant 0 : i32
    %83 = vector.broadcast %c0_i32_43 : i32 to vector<8x128xi32>
    %84 = arith.cmpi eq, %82, %83 : vector<8x128xi32>
    %cst_44 = arith.constant 0.000000e+00 : f32
    %85 = vector.shape_cast %40 : vector<1x1xf32> to vector<1x1xf32>
    %86 = vector.broadcast %85 : vector<1x1xf32> to vector<8x128xf32>
    %87 = vector.broadcast %cst_44 : f32 to vector<8x128xf32>
    %88 = arith.select %84, %86, %87 : vector<8x128xi1>, vector<8x128xf32>
    %c1_i32_45 = arith.constant 1 : i32
    %89 = vector.broadcast %c1_i32_45 : i32 to vector<8x128xi32>
    %90 = arith.cmpi eq, %82, %89 : vector<8x128xi32>
    %cst_46 = arith.constant 0.000000e+00 : f32
    %91 = vector.shape_cast %48 : vector<1x1xf32> to vector<1x1xf32>
    %92 = vector.broadcast %91 : vector<1x1xf32> to vector<8x128xf32>
    %93 = vector.broadcast %cst_46 : f32 to vector<8x128xf32>
    %94 = arith.select %90, %92, %93 : vector<8x128xi1>, vector<8x128xf32>
    %95 = arith.addf %88, %94 : vector<8x128xf32>
    %c0_47 = arith.constant 0 : index
    %c0_48 = arith.constant 0 : index
    %96 = vector.load %arg15[%c0_47, %c0_48] : memref<8x128xf32, #tpu.memory_space<vmem>>, vector<8x128xf32>
    tpu.vector_store %arg15[%c0_47, %c0_48], %95 {strides = array<i32>} : memref<8x128xf32, #tpu.memory_space<vmem>>, vector<8x128xf32>,
    return
  }
  func.func @transform_0(%arg0: i32) -> (i32, i32) {
    %c0_i32 = arith.constant 0 : i32
    %c0_i32_0 = arith.constant 0 : i32
    return %c0_i32, %arg0 : i32, i32
  }
  func.func @transform_1(%arg0: i32) -> (i32, i32) {
    %c0_i32 = arith.constant 0 : i32
    %c0_i32_0 = arith.constant 0 : i32
    return %c0_i32, %arg0 : i32, i32
  }
  func.func @transform_2(%arg0: i32) -> (i32, i32) {
    %c0_i32 = arith.constant 0 : i32
    %c0_i32_0 = arith.constant 0 : i32
    return %c0_i32, %arg0 : i32, i32
  }
  func.func @transform_3(%arg0: i32) -> (i32, i32) {
    %c0_i32 = arith.constant 0 : i32
    %c0_i32_0 = arith.constant 0 : i32
    return %c0_i32, %arg0 : i32, i32
  }
  func.func @transform_4(%arg0: i32) -> (i32, i32) {
    %c0_i32 = arith.constant 0 : i32
    %c0_i32_0 = arith.constant 0 : i32
    %c0_i32_1 = arith.constant 0 : i32
    return %c0_i32, %c0_i32_0 : i32, i32
  }
  func.func @transform_5(%arg0: i32) -> (i32, i32) {
    %c0_i32 = arith.constant 0 : i32
    %c0_i32_0 = arith.constant 0 : i32
    %c0_i32_1 = arith.constant 0 : i32
    return %c0_i32, %c0_i32_0 : i32, i32
  }
  func.func @transform_6(%arg0: i32) -> (i32, i32) {
    %c0_i32 = arith.constant 0 : i32
    %c0_i32_0 = arith.constant 0 : i32
    %c0_i32_1 = arith.constant 0 : i32
    return %c0_i32, %c0_i32_0 : i32, i32
  }
  func.func @transform_7(%arg0: i32) -> (i32, i32) {
    %c0_i32 = arith.constant 0 : i32
    %c0_i32_0 = arith.constant 0 : i32
    %c0_i32_1 = arith.constant 0 : i32
    return %c0_i32, %c0_i32_0 : i32, i32
  }
  func.func @transform_8(%arg0: i32) -> (i32, i32) {
    %c0_i32 = arith.constant 0 : i32
    %c0_i32_0 = arith.constant 0 : i32
    %c0_i32_1 = arith.constant 0 : i32
    return %c0_i32, %c0_i32_0 : i32, i32
  }
  func.func @transform_9(%arg0: i32) -> (i32, i32) {
    %c0_i32 = arith.constant 0 : i32
    %c0_i32_0 = arith.constant 0 : i32
    %c0_i32_1 = arith.constant 0 : i32
    return %c0_i32, %c0_i32_0 : i32, i32
  }
  func.func @transform_10(%arg0: i32) -> (i32, i32) {
    %c0_i32 = arith.constant 0 : i32
    %c0_i32_0 = arith.constant 0 : i32
    %c0_i32_1 = arith.constant 0 : i32
    return %c0_i32, %c0_i32_0 : i32, i32
  }
  func.func @transform_11(%arg0: i32) -> (i32, i32) {
    %c0_i32 = arith.constant 0 : i32
    %c0_i32_0 = arith.constant 0 : i32
    return %c0_i32, %arg0 : i32, i32
  }
  func.func @transform_12(%arg0: i32) -> (i32, i32) {
    %c0_i32 = arith.constant 0 : i32
    %c0_i32_0 = arith.constant 0 : i32
    return %c0_i32, %arg0 : i32, i32
  }
  func.func @transform_13(%arg0: i32) -> (i32, i32) {
    %c0_i32 = arith.constant 0 : i32
    %c0_i32_0 = arith.constant 0 : i32
    return %c0_i32, %arg0 : i32, i32
  }
  func.func @transform_14(%arg0: i32) -> (i32, i32) {
    %c0_i32 = arith.constant 0 : i32
    %c0_i32_0 = arith.constant 0 : i32
    return %arg0, %c0_i32 : i32, i32
  }
}

</mosaic_0001>

<bundles_post_ra>
// kernel: mul.97
= control target key start
LH: loop header
LB: loop body
LE: loop exit
PB: predicated region body
PF: predicated region fallthrough
CT: control target
= control target key end

     0   :  { %s364_s0 = inlined_call_operand.vmem [shape: f32[128,1], index: 0, kind: input, shape index: {}]   ;;  %s365_s1 = inlined_call_operand.vmem [shape: f32[128,1], index: 1, kind: input, shape index: {}]   ;;  %s366_s2 = inlined_call_operand.vmem [shape: f32[128,1], index: 2, kind: output, shape index: {}]  }
   0x1   :  { %v3_v0 = vld [vmem:[%s364_s0] sm:$0xff]  ;;  %v160_v2 = vld [vmem:[%s364_s0 + $0x8] sm:$0xff]  ;;  %v163_v5 = vld [vmem:[%s364_s0 + $0x10] sm:$0xff] }
   0x2   :  { %v4_v1 = vld [vmem:[%s365_s1] sm:$0xff]  ;;  %v161_v4 = vld [vmem:[%s365_s1 + $0x8] sm:$0xff]  ;;  %v164_v6 = vld [vmem:[%s365_s1 + $0x10] sm:$0xff] }
   0x3   :  { %v7_v3 = vmul.f32 %v4_v1, %v3_v0  ;;  %v16_v7 = vmul.f32 %v161_v4, %v160_v2  ;;  %v26_v8 = vmul.f32 %v164_v6, %v163_v5  ;;  %v166_v9 = vld [vmem:[%s364_s0 + $0x18] sm:$0xff]  ;;  %v169_v11 = vld [vmem:[%s364_s0 + $0x20] sm:$0xff]  ;;  %v172_v14 = vld [vmem:[%s364_s0 + $0x28] sm:$0xff] }
   0x4   :  { %v167_v10 = vld [vmem:[%s365_s1 + $0x18] sm:$0xff]  ;;  %v170_v13 = vld [vmem:[%s365_s1 + $0x20] sm:$0xff]  ;;  %v173_v15 = vld [vmem:[%s365_s1 + $0x28] sm:$0xff] }
   0x5   :  { %9 = vst [vmem:[%s366_s2] sm:$0xff] %v7_v3  ;;  %v36_v12 = vmul.f32 %v167_v10, %v166_v9  ;;  %v46_v16 = vmul.f32 %v170_v13, %v169_v11  ;;  %v56_v17 = vmul.f32 %v173_v15, %v172_v14  ;;  %v175_v18 = vld [vmem:[%s364_s0 + $0x30] sm:$0xff]  ;;  %v178_v20 = vld [vmem:[%s364_s0 + $0x38] sm:$0xff]  ;;  %v181_v23 = vld [vmem:[%s364_s0 + $0x40] sm:$0xff] }
   0x6   :  { %162 = vst [vmem:[%s366_s2 + $0x8] sm:$0xff] %v16_v7  ;;  %v176_v19 = vld [vmem:[%s365_s1 + $0x30] sm:$0xff]  ;;  %v179_v22 = vld [vmem:[%s365_s1 + $0x38] sm:$0xff]  ;;  %v182_v24 = vld [vmem:[%s365_s1 + $0x40] sm:$0xff] }
   0x7   :  { %165 = vst [vmem:[%s366_s2 + $0x10] sm:$0xff] %v26_v8  ;;  %v66_v21 = vmul.f32 %v176_v19, %v175_v18  ;;  %v76_v25 = vmul.f32 %v179_v22, %v178_v20  ;;  %v86_v26 = vmul.f32 %v182_v24, %v181_v23  ;;  %v184_v27 = vld [vmem:[%s364_s0 + $0x48] sm:$0xff]  ;;  %v187_v29 = vld [vmem:[%s364_s0 + $0x50] sm:$0xff]  ;;  %v190_v32 = vld [vmem:[%s364_s0 + $0x58] sm:$0xff] }
   0x8   :  { %168 = vst [vmem:[%s366_s2 + $0x18] sm:$0xff] %v36_v12  ;;  %v185_v28 = vld [vmem:[%s365_s1 + $0x48] sm:$0xff]  ;;  %v188_v31 = vld [vmem:[%s365_s1 + $0x50] sm:$0xff]  ;;  %v191_v33 = vld [vmem:[%s365_s1 + $0x58] sm:$0xff] }
   0x9   :  { %171 = vst [vmem:[%s366_s2 + $0x20] sm:$0xff] %v46_v16  ;;  %v96_v30 = vmul.f32 %v185_v28, %v184_v27  ;;  %v106_v34 = vmul.f32 %v188_v31, %v187_v29  ;;  %v116_v35 = vmul.f32 %v191_v33, %v190_v32  ;;  %v193_v36 = vld [vmem:[%s364_s0 + $0x60] sm:$0xff]  ;;  %v196_v38 = vld [vmem:[%s364_s0 + $0x68] sm:$0xff]  ;;  %v199_v41 = vld [vmem:[%s364_s0 + $0x70] sm:$0xff] }
   0xa   :  { %174 = vst [vmem:[%s366_s2 + $0x28] sm:$0xff] %v56_v17  ;;  %v194_v37 = vld [vmem:[%s365_s1 + $0x60] sm:$0xff]  ;;  %v197_v40 = vld [vmem:[%s365_s1 + $0x68] sm:$0xff]  ;;  %v200_v42 = vld [vmem:[%s365_s1 + $0x70] sm:$0xff] }
   0xb   :  { %177 = vst [vmem:[%s366_s2 + $0x30] sm:$0xff] %v66_v21  ;;  %v126_v39 = vmul.f32 %v194_v37, %v193_v36  ;;  %v136_v43 = vmul.f32 %v197_v40, %v196_v38  ;;  %v146_v44 = vmul.f32 %v200_v42, %v199_v41  ;;  %v202_v45 = vld [vmem:[%s364_s0 + $0x78] sm:$0xff] }
   0xc   :  { %180 = vst [vmem:[%s366_s2 + $0x38] sm:$0xff] %v76_v25  ;;  %v203_v46 = vld [vmem:[%s365_s1 + $0x78] sm:$0xff] }
   0xd   :  { %183 = vst [vmem:[%s366_s2 + $0x40] sm:$0xff] %v86_v26  ;;  %v156_v47 = vmul.f32 %v203_v46, %v202_v45 }
   0xe   :  { %186 = vst [vmem:[%s366_s2 + $0x48] sm:$0xff] %v96_v30 }
   0xf   :  { %189 = vst [vmem:[%s366_s2 + $0x50] sm:$0xff] %v106_v34 }
  0x10   :  { %192 = vst [vmem:[%s366_s2 + $0x58] sm:$0xff] %v116_v35 }
  0x11   :  { %195 = vst [vmem:[%s366_s2 + $0x60] sm:$0xff] %v126_v39 }
  0x12   :  { %198 = vst [vmem:[%s366_s2 + $0x68] sm:$0xff] %v136_v43 }
  0x13   :  { %201 = vst [vmem:[%s366_s2 + $0x70] sm:$0xff] %v146_v44 }
  0x14   :  { %204 = vst [vmem:[%s366_s2 + $0x78] sm:$0xff] %v156_v47 }

// kernel: solver_grad_4dvarnn_forward.2
= control target key start
LH: loop header
LB: loop body
LE: loop exit
PB: predicated region body
PF: predicated region fallthrough
CT: control target
= control target key end

     0   :  { %vm64_vm0 = vcmask 64512   ;;  %v200_v1 = vmov 0   ;;  %vm201_vm3 = vmmov 1   ;;  %v202_v16 = vmov 0.0   ;;  %s268_s0 = inlined_call_operand.vmem [shape: f32[8,256], index: 0, kind: input, shape index: {}]   ;;  %s269_s4 = inlined_call_operand.vmem [shape: f32[8,8], index: 4, kind: input, shape index: {}]   ;;  %s270_s5 = inlined_call_operand.vmem [shape: f32[8,1], index: 5, kind: input, shape index: {}]   ;;  %s271_s1 = inlined_call_operand.vmem [shape: f32[8,256], index: 1, kind: input, shape index: {}]   ;;  %s272_s2 = inlined_call_operand.vmem [shape: f32[8,256], index: 2, kind: input, shape index: {}]   ;;  %s273_s3 = inlined_call_operand.vmem [shape: f32[1,256], index: 3, kind: input, shape index: {}]   ;;  %s274_s6 = inlined_call_operand.vmem [shape: f32[8,128], index: 6, kind: output, shape index: {}]  }
   0x1   :  { %v23_v0 = vld [vmem:[%s268_s0] sm:$0xff]  ;;  %199 = vset.pattern.permute.xlu0 %v200_v1  ;;  %v24_v2 = vld [vmem:[%s268_s0 + $0x8] sm:$0xff] }
   0x2   :  { %83 = vmatpush.msra.mxu0 %v23_v0  ;;  %103 = vmatpush.msra.mxu1 %v24_v2  ;;  %v63_v3 = vld [vmem:[%s269_s4] sm:$0xff]  ;;  %v26_v6 = vld [vmem:[%s271_s1 + $0x8] sm:$0xff] }
   0x3   :  { %v110_v4 = vld [vmem:[%s270_s5] sm:$0xff]  ;;  %186 = vmatmul.msk.f32.vlgmr.msra.gmra.mxu0 %vm64_vm0, %v63_v3  ;;  %187 = vmatmul.msk.f32.vlgmr.msra.gmra.mxu1 %vm64_vm0, %v63_v3  ;;  %v31_v8 = vsub.f32 %v24_v2, %v26_v6  ;;  %v28_v10 = vld [vmem:[%s272_s2 + $0x8] sm:$0xff]  ;;  %vm60_vm7 = vcmp.ne.f32.partialorder %v26_v6, %v26_v6 }
   0x4   :  { %115 = vperm.xlu0 %199, %v110_v4   ;;  %v25_v5 = vld [vmem:[%s271_s1] sm:$0xff]  ;;  %v62_v23 = vsel %vm60_vm7, 0.0, %v26_v6 }
   0x5   :  { %v30_v7 = vsub.f32 %v23_v0, %v25_v5  ;;  %v27_v9 = vld [vmem:[%s272_s2] sm:$0xff]  ;;  %v33_v12 = vmul.f32 %v31_v8, %v28_v10  ;;  %vm59_vm6 = vcmp.ne.f32.partialorder %v25_v5, %v25_v5  ;;  %v112_v25 = vsub.f32 %v24_v2, %v62_v23 }
   0x6   :  { %v29_v13 = vld [vmem:[%s273_s3] sm:$0x3]  ;;  %v61_v22 = vsel %vm59_vm6, 0.0, %v25_v5 }
   0x7   :  { %v32_v11 = vmul.f32 %v30_v7, %v27_v9  ;;  %vm35_vm2 = vcmp.ne.f32.partialorder %v33_v12, %v33_v12  ;;  %v43_v14 = vperm.slane %v29_v13, 0  ;;  %v44_v15 = vperm.slane %v29_v13, 1 }
   0x8   :  { %vm37_vm5 = vmxor %vm35_vm2, %vm201_vm3  ;;  %v111_v24 = vsub.f32 %v23_v0, %v61_v22  ;;  %v162_v12 = vlaneseq }
   0x9   :  { %vm34_vm1 = vcmp.ne.f32.partialorder %v32_v11, %v32_v11  ;;  %v185_v18 = vsel %vm37_vm5, 1.0, %v202_v16 }
   0xa   :  { %vm36_vm4 = vmxor %vm34_vm1, %vm201_vm3  ;;  %v48_v20 = vmul.f32 %v185_v18, %v44_v15  ;;  %v163_v13 = vshrl.u32 %v162_v12, 7 }
   0xb   :  { %v184_v17 = vsel %vm36_vm4, 1.0, %v202_v16 }
   0xc   :  { %v47_v19 = vmul.f32 %v184_v17, %v43_v14  ;;  %vm164_vm8 = vcmp.eq.s32.totalorder %v163_v13, 0  ;;  %vm167_vm9 = vcmp.eq.s32.totalorder %v163_v13, 1  ;;  %vm171_vm10 = vcmp.eq.s32.totalorder %v163_v13, 2 }
   0xd   :  { %vm175_vm11 = vcmp.eq.s32.totalorder %v163_v13, 3 }
   0xe   :  { %v49_v21 = vadd.f32 %v48_v20, %v47_v19 }
  0x2e   :  { %50 = vadd.xlane.f32.xlu0 %v49_v21 }
  0x76   :  { %v116_v26 = vpop.permute.xlu0 %115 }
  0x77   :  { %v118_v27 = vmul.f32 %v116_v26, %v111_v24  ;;  %v119_v28 = vmul.f32 %v116_v26, %v112_v25 }
  0x79   :  { %v120_v29 = vmul.f32 %v118_v27, %v27_v9  ;;  %v121_v30 = vmul.f32 %v119_v28, %v28_v10 }
  0x7b   :  { %v122_v31 = vmul.f32 %v120_v29, %v27_v9  ;;  %v123_v32 = vmul.f32 %v121_v30, %v28_v10 }
  0x7d   :  { %v124_v33 = vmul.f32 %v122_v31, %v43_v14  ;;  %v125_v34 = vmul.f32 %v123_v32, %v44_v15 }
  0x7f   :  { %v150_v35 = vmul.f32 %v124_v33, %v124_v33  ;;  %v151_v36 = vmul.f32 %v125_v34, %v125_v34 }
  0x80   :  { %v85_v37 = vpop.f32.mrf.mxu0  ;;  %v105_v38 = vpop.f32.mrf.mxu1 }
  0x81   :  { %v108_v39 = vmul.f32 %v85_v37, %v43_v14  ;;  %v109_v40 = vmul.f32 %v105_v38, %v44_v15  ;;  %v152_v41 = vadd.f32 %v151_v36, %v150_v35 }
  0x83   :  { %v126_v42 = vmul.f32 %v108_v39, %v108_v39  ;;  %v127_v43 = vmul.f32 %v109_v40, %v109_v40  ;;  %153 = vadd.xlane.f32.xlu2 %v152_v41  ;;  %v138_v45 = vmul.f32 %v124_v33, %v108_v39  ;;  %v139_v46 = vmul.f32 %v125_v34, %v109_v40 }
  0x85   :  { %v128_v44 = vadd.f32 %v127_v43, %v126_v42  ;;  %v140_v47 = vadd.f32 %v139_v46, %v138_v45 }
  0x87   :  { %129 = vadd.xlane.f32.xlu1 %v128_v44 }
  0x8f   :  { %141 = vadd.xlane.f32.xlu1 %v140_v47 }
  0xa1   :  { %v51_v48 = vpop.xlane.xlu0 %50 }
  0xa2   :  { %v52_v49 = vrot.slane %v51_v48, 4 }
  0xa4   :  { %v53_v50 = vadd.f32 %v52_v49, %v51_v48 }
  0xa6   :  { %v54_v51 = vrot.slane %v53_v50, 2 }
  0xa8   :  { %v55_v52 = vadd.f32 %v54_v51, %v53_v50 }
  0xaa   :  { %v56_v53 = vrot.slane %v55_v52, 1 }
  0xac   :  { %v57_v54 = vadd.f32 %v56_v53, %v55_v52 }
  0xae   :  { %188 = vpush %v57_v54 }
  0xdf   :  { %s189_s1 = spop %188 }
  0xe0   :  { %v165_v14 = vstv %s189_s1 }
  0xe1   :  { %v166_v16 = vsel %vm164_vm8, %v165_v14, 0.0 }
  0xf6   :  { %v154_v55 = vpop.xlane.xlu2 %153 }
  0xf7   :  { %v155_v57 = vrot.slane %v154_v55, 4 }
  0xf9   :  { %v156_v60 = vadd.f32 %v155_v57, %v154_v55 }
  0xfa   :  { %v130_v56 = vpop.xlane.xlu1 %129 }
  0xfb   :  { %v131_v58 = vrot.slane %v130_v56, 4  ;;  %v157_v63 = vrot.slane %v156_v60, 2 }
  0xfd   :  { %v132_v59 = vadd.f32 %v131_v58, %v130_v56  ;;  %v158_v5 = vadd.f32 %v157_v63, %v156_v60 }
  0xff   :  { %v133_v61 = vrot.slane %v132_v59, 2  ;;  %v159_v8 = vrot.slane %v158_v5, 1 }
 0x101   :  { %v134_v62 = vadd.f32 %v133_v61, %v132_v59  ;;  %v160_v11 = vadd.f32 %v159_v8, %v158_v5 }
 0x102   :  { %v142_v0 = vpop.xlane.xlu1 %141 }
 0x103   :  { %v143_v1 = vrot.slane %v142_v0, 4  ;;  %v135_v2 = vrot.slane %v134_v62, 1 }
 0x105   :  { %v144_v3 = vadd.f32 %v143_v1, %v142_v0  ;;  %v136_v4 = vadd.f32 %v135_v2, %v134_v62 }
 0x107   :  { %v145_v6 = vrot.slane %v144_v3, 2  ;;  %190 = vpush %v136_v4 }
 0x109   :  { %v146_v7 = vadd.f32 %v145_v6, %v144_v3 }
 0x10b   :  { %v147_v9 = vrot.slane %v146_v7, 1 }
 0x10d   :  { %v148_v10 = vadd.f32 %v147_v9, %v146_v7 }
 0x10f   :  { %192 = vpush %v148_v10 }
 0x110   :  { %194 = vpush %v160_v11 }
 0x138   :  { %s191_s2 = spop %190 }
 0x139   :  { %v168_v15 = vstv %s191_s2 }
 0x13a   :  { %v169_v17 = vsel %vm167_vm9, %v168_v15, 0.0 }
 0x13b   :  { %v170_v18 = vadd.f32 %v169_v17, %v166_v16 }
 0x140   :  { %s193_s3 = spop %192 }
 0x141   :  { %v172_v19 = vstv %s193_s3  ;;  %s195_s12 = spop %194 }
 0x142   :  { %v173_v20 = vsel %vm171_vm10, %v172_v19, 0.0  ;;  %v176_v21 = vstv %s195_s12 }
 0x143   :  { %v174_v22 = vadd.f32 %v173_v20, %v170_v18  ;;  %v177_v23 = vsel %vm175_vm11, %v176_v21, 0.0 }
 0x145   :  { %v178_v24 = vadd.f32 %v177_v23, %v174_v22 }
 0x147   :  { %179 = vst [vmem:[%s274_s6] sm:$0xff] %v178_v24 }

// kernel: solver_grad_4dvarnn_forward.3
= control target key start
LH: loop header
LB: loop body
LE: loop exit
PB: predicated region body
PF: predicated region fallthrough
CT: control target
= control target key end

     0   :  { %s2568_s0 = inlined_call_operand.vmem [shape: f32[8,256], index: 0, kind: input, shape index: {}]   ;;  %s2569_s1 = inlined_call_operand.vmem [shape: f32[8,256], index: 1, kind: input, shape index: {}]   ;;  %s2570_s2 = inlined_call_operand.vmem [shape: f32[8,256], index: 2, kind: input, shape index: {}]   ;;  %s2571_s3 = inlined_call_operand.vmem [shape: f32[1,256], index: 3, kind: input, shape index: {}]   ;;  %s2572_s4 = inlined_call_operand.vmem [shape: f32[128,48], index: 4, kind: input, shape index: {}]   ;;  %s2573_s5 = inlined_call_operand.vmem [shape: f32[128,1], index: 5, kind: input, shape index: {}]   ;;  %s2574_s6 = inlined_call_operand.vmem [shape: f32[8,32], index: 6, kind: input, shape index: {}]   ;;  %s2575_s7 = inlined_call_operand.vmem [shape: f32[8,1], index: 7, kind: input, shape index: {}]   ;;  %s2576_s8 = inlined_call_operand.vmem [shape: f32[8,1], index: 8, kind: input, shape index: {}]   ;;  %s2577_s9 = inlined_call_operand.vmem [shape: f32[8,1], index: 9, kind: input, shape index: {}]   ;;  %s2578_s10 = inlined_call_operand.vmem [shape: f32[8,8], index: 10, kind: input, shape index: {}]   ;;  %s2579_s11 = inlined_call_operand.vmem [shape: f32[8,256], index: 11, kind: output, shape index: {0}]   ;;  %s2580_s12 = inlined_call_operand.vmem [shape: f32[32,256], index: 12, kind: output, shape index: {1}]   ;;  %s2581_s13 = inlined_call_operand.vmem [shape: f32[32,256], index: 13, kind: output, shape index: {2}]   ;;  %s2582_s14 = inlined_call_operand.vmem [shape: f32[16,128], index: 14, kind: output, shape index: {3}]  }
   0x1   :  { %2590 = sst [smem:[#allocation22_spill]] %s2575_s7 }
   0x2   :  { %2591 = sst [smem:[#allocation23_spill]] %s2580_s12 }
   0x3   :  { %2592 = sst [smem:[#allocation24_spill]] %s2581_s13 }
   0x4   :  { %s2022_s29 = smov 0   ;;  %s2024_s30 = smov 0  }
   0x5   :  { %s2026_s15 = smov 0  }
   0x6 LB: > { %2593 = sst [smem:[#allocation4_spill]] %s1899_s30  ;;  %s2033_s16 = sadd.s32 4294967295, %s1903_s15   ;;  %s1903_s15 = sphi %s2026_s15, %s2655_s15   ;;  %s1899_s30 = sphi %s2024_s30, %s2657_s30   ;;  %s1895_s29 = sphi %s2022_s29, %s2656_s29  }
   0x7   : > { %s2035_s17 = sadd.s32 1, %s1903_s15   ;;  %s309_s19 = sadd.s32 1, %s1899_s30 }
   0x8   : > { %2594 = sst [smem:[#allocation5_spill]] %s2035_s17  ;;  %s306_s18 = ssub.s32 %s1903_s15, %s2035_s17 }
   0x9   : > { %p307_p0 = scmp.eq.s32.totalorder %s306_s18, 0  ;;  %p319_p1 = scmp.ne.s32.totalorder %s1899_s30, %s1895_s29 }
   0xa   : > { %p320_p2 = scmp.eq.s32.totalorder %s2033_s16, 1  ;;  %p1559_p3 = scmp.ge.s32.totalorder %s1903_s15, 1 }
   0xb   : > { %s2042_s20 = scalar_select %p307_p0, %s1899_s30, %s309_s19  }
   0xc   : > { %p2044_p4 = por %p320_p2, %p319_p1  ;;  %p444_p5 = scmp.lt.s32.totalorder %s1903_s15, 3 }
   0xd   : > { %2595 = sst [smem:[#allocation6_spill]] %s2042_s20 }
   0xe   : > { %p445_p6 = pnand %p1559_p3, %p444_p5 }
  0x10   : > { %448 = sbr.rel (%p445_p6) target bundleno = 929 (0x3a1), region = 64 }
  0x15   : > { %s2597_s7 = sld [smem:[#allocation22_spill]]  ;;  %p511_p7 = scmp.lt.s32.totalorder %s2033_s16, 1  ;;  %v2586_v1 = vmov 0   ;;  %v2089_v6 = vld [vmem:[%s2572_s4] sm:$0xff]  ;;  %v2094_v7 = vld [vmem:[%s2572_s4 + $0x8] sm:$0xff]  ;;  %v2099_v8 = vld [vmem:[%s2572_s4 + $0x10] sm:$0xff] }
  0x16   : > { %s496_s24 = sand.u32 1, %s1895_s29   ;;  %1754 = vset.pattern.permute.xlu0 %v2586_v1  ;;  %v2104_v9 = vld [vmem:[%s2572_s4 + $0x18] sm:$0xff]  ;;  %v2109_v10 = vld [vmem:[%s2572_s4 + $0x20] sm:$0xff]  ;;  %v2114_v11 = vld [vmem:[%s2572_s4 + $0x28] sm:$0xff]  ;;  %v2282_v46 = vmov 0.0   ;;  %v2284_v47 = vmov 0.0  }
  0x17   : > { %s2053_s25 = sshll.u32 %s496_s24, 5  ;;  %2600 = vst [vmem:[#allocation9_spill] sm:$0xff] %v2104_v9  ;;  %v2119_v12 = vld [vmem:[%s2572_s4 + $0x30] sm:$0xff]  ;;  %v2124_v13 = vld [vmem:[%s2572_s4 + $0x38] sm:$0xff]  ;;  %v2129_v14 = vld [vmem:[%s2572_s4 + $0x40] sm:$0xff]  ;;  %v2286_v48 = vmov 0.0  }
  0x18   : > { %s512_s26 = scalar_select %p511_p7, %s2033_s16, 1  ;;  %2601 = vst [vmem:[#allocation10_spill] sm:$0xff] %v2124_v13  ;;  %v2134_v15 = vld [vmem:[%s2572_s4 + $0x48] sm:$0xff]  ;;  %v2139_v16 = vld [vmem:[%s2572_s4 + $0x50] sm:$0xff]  ;;  %v2144_v17 = vld [vmem:[%s2572_s4 + $0x58] sm:$0xff]  ;;  %v2288_v49 = vmov 0.0  }
  0x19   : > { %v2149_v18 = vld [vmem:[%s2572_s4 + $0x60] sm:$0xff]  ;;  %v2154_v19 = vld [vmem:[%s2572_s4 + $0x68] sm:$0xff]  ;;  %v2159_v20 = vld [vmem:[%s2572_s4 + $0x70] sm:$0xff]  ;;  %s2277_s23 = scalar_lea.vmem [#allocation2], %s2053_s25  ;;  %v2290_v50 = vmov 0.0   ;;  %v2292_v51 = vmov 0.0  }
  0x1a   : > { %s2056_s27 = sshll.u32 %s512_s26, 3  ;;  %s525_s28 = scalar_lea.vmem %s2571_s3, %s512_s26  ;;  %2602 = vst [vmem:[#allocation11_spill] sm:$0xff] %v2159_v20  ;;  %v2164_v21 = vld [vmem:[%s2572_s4 + $0x78] sm:$0xff]  ;;  %v2169_v22 = vld [vmem:[%s2573_s5] sm:$0xff]  ;;  %v2174_v23 = vld [vmem:[%s2573_s5 + $0x8] sm:$0xff]  ;;  %v2294_v52 = vmov 0.0  }
  0x1b   : > { %v576_v0 = vld [vmem:[%s2597_s7] sm:$0xff]  ;;  %s529_s18 = scalar_lea.vmem %s2579_s11, %s2056_s27  ;;  %s533_s29 = scalar_lea.vmem %s2582_s14, %s2056_s27  ;;  %2603 = vst [vmem:[#allocation12_spill] sm:$0xff] %v2164_v21  ;;  %v2179_v24 = vld [vmem:[%s2573_s5 + $0x10] sm:$0xff]  ;;  %v2184_v25 = vld [vmem:[%s2573_s5 + $0x18] sm:$0xff]  ;;  %v2296_v53 = vmov 0.0  }
  0x1c   : > { %579 = vperm.xlu0 %1754, %v576_v0   ;;  %s514_s24 = scalar_lea.vmem %s2568_s0, %s2056_s27  ;;  %s518_s17 = scalar_lea.vmem %s2569_s1, %s2056_s27  ;;  %v2079_v4 = vld [vmem:[%s525_s28] sm:$0x1]  ;;  %v2194_v27 = vld [vmem:[%s2573_s5 + $0x28] sm:$0xff]  ;;  %v2199_v28 = vld [vmem:[%s2573_s5 + $0x30] sm:$0xff] }
  0x1d   : > { %v534_v2 = vld [vmem:[%s514_s24] sm:$0xff]   ;;  %2599 = vst [vmem:[#allocation8_spill] sm:$0xff] %v2079_v4  ;;  %v2204_v29 = vld [vmem:[%s2573_s5 + $0x38] sm:$0xff]  ;;  %v2214_v31 = vld [vmem:[%s2573_s5 + $0x48] sm:$0xff]  ;;  %s522_s22 = scalar_lea.vmem %s2570_s2, %s2056_s27  ;;  %s2280_s24 = scalar_lea.vmem [#allocation3], %s2053_s25 }
  0x1e   : > { %v2077_v3 = vld [vmem:[%s518_s17] sm:$0xff]  ;;  %2605 = vst [vmem:[#allocation14_spill] sm:$0xff] %v2214_v31  ;;  %v2219_v32 = vld [vmem:[%s2573_s5 + $0x50] sm:$0xff]  ;;  %v2224_v33 = vld [vmem:[%s2573_s5 + $0x58] sm:$0xff]  ;;  %s2300_s25 = smov 0  }
  0x1f   : > { %2598 = vst [vmem:[#allocation7_spill] sm:$0xff] %v2077_v3  ;;  %vm574_vm0 = vcmp.ne.f32.partialorder %v2077_v3, %v2077_v3  ;;  %v2189_v26 = vld [vmem:[%s2573_s5 + $0x20] sm:$0xff]  ;;  %v2234_v35 = vld [vmem:[%s2573_s5 + $0x68] sm:$0xff]  ;;  %v2239_v36 = vld [vmem:[%s2573_s5 + $0x70] sm:$0xff] }
  0x20   : > { %v2084_v5 = vsel %vm574_vm0, 0.0, %v2077_v3  ;;  %v2209_v30 = vld [vmem:[%s2573_s5 + $0x40] sm:$0xff]  ;;  %2606 = vst [vmem:[#allocation15_spill] sm:$0xff] %v2219_v32  ;;  %v2244_v37 = vld [vmem:[%s2573_s5 + $0x78] sm:$0xff] }
  0x21   : > { %2604 = vst [vmem:[#allocation13_spill] sm:$0xff] %v2209_v30  ;;  %v2229_v34 = vld [vmem:[%s2573_s5 + $0x60] sm:$0xff] }
  0x22   : > { %2607 = vst [vmem:[#allocation16_spill] sm:$0xff] %v2224_v33  ;;  %v2249_v38 = vld [vmem:[%s2574_s6] sm:$0xff] }
  0x23   : > { %2608 = vst [vmem:[#allocation17_spill] sm:$0xff] %v2229_v34  ;;  %v2254_v39 = vld [vmem:[%s2578_s10] sm:$0xff] }
  0x24   : > { %2609 = vst [vmem:[#allocation18_spill] sm:$0xff] %v2234_v35  ;;  %v2259_v40 = vld [vmem:[%s2576_s8] sm:$0xff] }
  0x25   : > { %2610 = vst [vmem:[#allocation19_spill] sm:$0xff] %v2259_v40  ;;  %v2264_v41 = vld [vmem:[%s2577_s9] sm:$0xff] }
  0x26   : > { %2611 = vst [vmem:[#allocation20_spill] sm:$0xff] %v2264_v41  ;;  %v2270_v42 = vld [vmem:[%s522_s22] sm:$0xff] }
  0x27   : > { %2612 = vst [vmem:[#allocation21_spill] sm:$0xff] %v2270_v42 }
  0x8e   : > { %v580_v43 = vpop.permute.xlu0 %579 }
  0x8f   : > { %v582_v44 = vmul.f32 %v580_v43, %v2270_v42 }
  0x91   : > { %v2274_v45 = vmul.f32 %v582_v44, %v2270_v42 }
  0x92 LB: >> { %v1946_v54 = vmov 0   ;;  %740 = vmatpush.msra.mxu0 %v1923_v50  ;;  %1609 = vmatpush.msra.mxu2 %v1923_v50  ;;  %v599_v55 = vsub.f32 %v1939_v2, %v2084_v5  ;;  %vm681_vm1 = vcmask 392192   ;;  %v2613_v13 = vld [vmem:[#allocation10_spill] sm:$0xff]  ;;  %v2615_v33 = vld [vmem:[#allocation16_spill] sm:$0xff]  ;;  %v2616_v9 = vld [vmem:[#allocation9_spill] sm:$0xff]  ;;  %vm855_vm2 = vcmask 261120   ;;  %s1943_s25 = sphi %s2300_s25, %s589_s25   ;;  %v1939_v2 = vphi %v534_v2, %v2636_v2   ;;  %v1935_v53 = vphi %v2296_v53, %v2635_v53   ;;  %v1931_v52 = vphi %v2294_v52, %v2634_v52   ;;  %v1927_v51 = vphi %v2292_v51, %v2633_v51   ;;  %v1923_v50 = vphi %v2290_v50, %v2632_v50   ;;  %v1919_v49 = vphi %v2288_v49, %v2631_v49   ;;  %v1915_v48 = vphi %v2286_v48, %v2630_v48   ;;  %v1911_v47 = vphi %v2284_v47, %v2629_v47   ;;  %v1907_v46 = vphi %v2282_v46, %v2628_v46  }
  0x93   : >> { %1755 = vset.pattern.permute.xlu0 %v1946_v54  ;;  %1756 = vset.pattern.permute.xlu1 %v1946_v54  ;;  %v2614_v35 = vld [vmem:[#allocation18_spill] sm:$0xff]  ;;  %v2617_v20 = vld [vmem:[#allocation11_spill] sm:$0xff]  ;;  %v2619_v34 = vld [vmem:[#allocation17_spill] sm:$0xff]  ;;  %s589_s25 = sadd.s32 1, %s1943_s25  }
  0x94   : >> { %618 = vperm.xlu0 %1755, %v2184_v25   ;;  %1610 = vmatpush.msra.mxu3 %v1923_v50  ;;  %v600_v56 = vmul.f32 %v599_v55, %v2274_v45  ;;  %v2618_v32 = vld [vmem:[#allocation15_spill] sm:$0xff]  ;;  %v2620_v30 = vld [vmem:[#allocation13_spill] sm:$0xff]  ;;  %v2621_v21 = vld [vmem:[#allocation12_spill] sm:$0xff]  ;;  %p586_p8 = scmp.ge.s32.totalorder %s589_s25, 2  }
  0x95   : >> { %741 = vmatpush.msra.mxu0 %v1927_v51  ;;  %613 = vperm.xlu1 %1756, %v2179_v24   ;;  %v2622_v31 = vld [vmem:[#allocation14_spill] sm:$0xff]  ;;  %vm889_vm3 = vcmask (%p586_p8), 64512   ;;  %vm918_vm5 = vcmask (%p586_p8), 7168  }
  0x96   : >> { %1612 = vmatpush.msra.mxu2 %v1927_v51  ;;  %1613 = vmatpush.msra.mxu3 %v1927_v51 }
  0x97   : >> { %742 = vmatpush.msra.mxu0 %v1931_v52  ;;  %1608 = vmatpush.msra.mxu1 %v1923_v50 }
  0x98   : >> { %1615 = vmatpush.msra.mxu2 %v1931_v52  ;;  %1616 = vmatpush.msra.mxu3 %v1931_v52 }
  0x99   : >> { %743 = vmatpush.msra.mxu0 %v1935_v53  ;;  %1611 = vmatpush.msra.mxu1 %v1927_v51 }
  0x9a   : >> { %1618 = vmatpush.msra.mxu2 %v1935_v53  ;;  %1619 = vmatpush.msra.mxu3 %v1935_v53 }
  0x9b   : >> { %744 = vmatpush.msra.mxu0 %v600_v56  ;;  %1614 = vmatpush.msra.mxu1 %v1931_v52 }
  0x9c   : >> { %638 = vperm.xlu0 %1755, %v2204_v29   ;;  %1621 = vmatpush.msra.mxu2 %v600_v56 }
  0x9d   : >> { %1622 = vmatpush.msra.mxu3 %v600_v56  ;;  %745 = vmatpush.msra.mxu0 %v1939_v2 }
  0x9e   : >> { %1624 = vmatpush.msra.mxu2 %v1939_v2  ;;  %1567 = vmatmul.msk.f32.vlgmr.msra.gmra.mxu0 %vm681_vm1, %v2089_v6 }
  0x9f   : >> { %1625 = vmatpush.msra.mxu3 %v1939_v2  ;;  %1573 = vmatmul.msk.f32.vlgmr.msra.gmra.mxu2 %vm681_vm1, %v2119_v12 }
  0xa0   : >> { %1578 = vmatmul.msk.f32.vlgmr.msra.gmra.mxu3 %vm681_vm1, %v2144_v17  ;;  %633 = vperm.xlu1 %1756, %v2199_v28  }
  0xa1   : >> { %1617 = vmatpush.msra.mxu1 %v1935_v53  ;;  %1757 = vset.pattern.permute.xlu2 %v1946_v54 }
  0xa2   : >> { %608 = vperm.xlu2 %1757, %v2174_v23  }
  0xa3   : >> { %1620 = vmatpush.msra.mxu1 %v600_v56 }
  0xa4   : >> { %678 = vperm.xlu0 %1755, %v2244_v37  }
  0xa5   : >> { %1623 = vmatpush.msra.mxu1 %v1939_v2 }
  0xa6   : >> { %1571 = vmatmul.msk.f32.vlgmr.msra.gmra.mxu1 %vm681_vm1, %v2109_v10  ;;  %1568 = vmatmul.msk.f32.gmra.mxu0 %vm681_vm1, %v2094_v7 }
  0xa7   : >> { %1574 = vmatmul.msk.f32.gmra.mxu2 %vm681_vm1, %v2613_v13 }
  0xa8   : >> { %1579 = vmatmul.msk.f32.gmra.mxu3 %vm681_vm1, %v2149_v18  ;;  %603 = vperm.xlu1 %1756, %v2169_v22  }
  0xaa   : >> { %628 = vperm.xlu2 %1757, %v2194_v27  }
  0xac   : >> { %673 = vperm.xlu0 %1755, %v2239_v36  }
  0xae   : >> { %1572 = vmatmul.msk.f32.gmra.mxu1 %vm681_vm1, %v2114_v11  ;;  %1569 = vmatmul.msk.f32.gmra.mxu0 %vm681_vm1, %v2099_v8 }
  0xaf   : >> { %1575 = vmatmul.msk.f32.gmra.mxu2 %vm681_vm1, %v2129_v14 }
  0xb0   : >> { %1580 = vmatmul.msk.f32.gmra.mxu3 %vm681_vm1, %v2154_v19  ;;  %668 = vperm.xlu1 %1756, %v2614_v35  }
  0xb2   : >> { %623 = vperm.xlu2 %1757, %v2189_v26  }
  0xb4   : >> { %658 = vperm.xlu0 %1755, %v2615_v33  }
  0xb6   : >> { %1570 = vmatmul.msk.f32.gmra.mxu0 %vm681_vm1, %v2616_v9 }
  0xb7   : >> { %1576 = vmatmul.msk.f32.gmra.mxu2 %vm681_vm1, %v2134_v15 }
  0xb8   : >> { %1581 = vmatmul.msk.f32.gmra.mxu3 %vm681_vm1, %v2617_v20  ;;  %653 = vperm.xlu1 %1756, %v2618_v32  }
  0xba   : >> { %663 = vperm.xlu2 %1757, %v2619_v34  }
  0xbc   : >> { %643 = vperm.xlu0 %1755, %v2620_v30  }
  0xbf   : >> { %1577 = vmatmul.msk.f32.gmra.mxu2 %vm681_vm1, %v2139_v16 }
  0xc0   : >> { %1582 = vmatmul.msk.f32.gmra.mxu3 %vm681_vm1, %v2621_v21 }
  0xc2   : >> { %648 = vperm.xlu2 %1757, %v2622_v31  }
  0xfc   : >> { %v609_v60 = vpop.permute.xlu2 %608 }
 0x104   : >> { %v629_v44 = vpop.permute.xlu2 %628 }
 0x106   : >> { %v619_v57 = vpop.permute.xlu0 %618 }
 0x107   : >> { %v614_v58 = vpop.permute.xlu1 %613 }
 0x10c   : >> { %v624_v1 = vpop.permute.xlu2 %623 }
 0x10e   : >> { %v639_v61 = vpop.permute.xlu0 %638 }
 0x112   : >> { %v634_v43 = vpop.permute.xlu1 %633 }
 0x116   : >> { %v679_v51 = vpop.permute.xlu0 %678 }
 0x11a   : >> { %v604_v55 = vpop.permute.xlu1 %603 }
 0x11b   : >> { %v747_v59 = vpop.f32.mrf.mxu0 }
 0x11c   : >> { %v748_v56 = vadd.f32 %v747_v59, %v604_v55 }
 0x11e   : >> { %v674_v3 = vpop.permute.xlu0 %673  ;;  %1758 = vtanh.f32 %v748_v56 }
 0x122   : >> { %v765_v62 = vpop.f32.mrf.mxu2  ;;  %v669_v9 = vpop.permute.xlu1 %668 }
 0x123   : >> { %v780_v63 = vpop.f32.mrf.mxu3  ;;  %v750_v0 = vpop.f32.mrf.mxu0  ;;  %v766_v41 = vadd.f32 %v765_v62, %v634_v43 }
 0x124   : >> { %v759_v50 = vpop.f32.mrf.mxu1  ;;  %v751_v31 = vadd.f32 %v750_v0, %v609_v60  ;;  %v1759_v62 = vpop.eup %1758 }
 0x125   : >> { %1760 = vtanh.f32 %v766_v41  ;;  %v760_v30 = vadd.f32 %v759_v50, %v624_v1  ;;  %v664_v43 = vpop.permute.xlu2 %663 }
 0x126   : >> { %1762 = vtanh.f32 %v751_v31  ;;  %v659_v0 = vpop.permute.xlu0 %658 }
 0x12a   : >> { %v768_v52 = vpop.f32.mrf.mxu2 }
 0x12b   : >> { %v783_v53 = vpop.f32.mrf.mxu3  ;;  %v753_v54 = vpop.f32.mrf.mxu0  ;;  %v769_v13 = vadd.f32 %v768_v52, %v639_v61 }
 0x12c   : >> { %v762_v4 = vpop.f32.mrf.mxu1  ;;  %v754_v32 = vadd.f32 %v753_v54, %v614_v58  ;;  %v1761_v60 = vpop.eup %1760  ;;  %v784_v41 = vadd.f32 %v783_v53, %v664_v43  ;;  %v811_v54 = vmul.f32 0.5, %v1759_v62 }
 0x12d   : >> { %v763_v21 = vadd.f32 %v762_v4, %v629_v44  ;;  %v1763_v58 = vpop.eup %1762  ;;  %v654_v52 = vpop.permute.xlu1 %653 }
 0x12e   : >> { %1764 = vtanh.f32 %v754_v32  ;;  %v649_v43 = vpop.permute.xlu2 %648 }
 0x12f   : >> { %1766 = vtanh.f32 %v763_v21  ;;  %v821_v21 = vmul.f32 0.5, %v1761_v60 }
 0x130   : >> { %1768 = vtanh.f32 %v760_v30 }
 0x131   : >> { %1770 = vtanh.f32 %v769_v13  ;;  %v825_v53 = vadd.f32 0.5, %v821_v21 }
 0x132   : >> { %v2379_v40 = vpop.f32.mrf.mxu2 }
 0x133   : >> { %v786_v42 = vpop.f32.mrf.mxu3  ;;  %v756_v34 = vpop.f32.mrf.mxu0 }
 0x134   : >> { %v757_v59 = vadd.f32 %v756_v34, %v619_v57  ;;  %v787_v4 = vadd.f32 %v786_v42, %v669_v9  ;;  %v1765_v1 = vpop.eup %1764  ;;  %v812_v57 = vmul.f32 0.5, %v1763_v58 }
 0x135   : >> { %v1767_v31 = vpop.eup %1766  ;;  %v813_v34 = vmul.f32 0.5, %v1765_v1 }
 0x136   : >> { %1772 = vtanh.f32 %v757_v59  ;;  %v1769_v32 = vpop.eup %1768  ;;  %v820_v44 = vmul.f32 0.5, %v1767_v31  ;;  %v816_v60 = vadd.f32 0.5, %v812_v57 }
 0x137   : >> { %v1771_v61 = vpop.eup %1770  ;;  %v817_v59 = vadd.f32 0.5, %v813_v34 }
 0x13a   : >> { %v774_v55 = vpop.f32.mrf.mxu2 }
 0x13b   : >> { %v789_v35 = vpop.f32.mrf.mxu3  ;;  %v775_v58 = vadd.f32 %v774_v55, %v649_v43 }
 0x13c   : >> { %v790_v20 = vadd.f32 %v789_v35, %v674_v3  ;;  %v1773_v13 = vpop.eup %1772  ;;  %v781_v3 = vadd.f32 %v780_v63, %v659_v0  ;;  %v819_v35 = vmul.f32 0.5, %v1769_v32  ;;  %v644_v63 = vpop.permute.xlu0 %643 }
 0x13d   : >> { %v814_v1 = vmul.f32 0.5, %v1773_v13 }
 0x13e   : >> { %1774 = vtanh.f32 %v790_v20  ;;  %v822_v20 = vmul.f32 0.5, %v1771_v61  ;;  %v823_v33 = vadd.f32 0.5, %v819_v35  ;;  %v837_v61 = vmul.f32 %v1911_v47, %v825_v53 }
 0x13f   : >> { %1776 = vtanh.f32 %v787_v4  ;;  %v824_v4 = vadd.f32 0.5, %v820_v44 }
 0x140   : >> { %1778 = vtanh.f32 %v784_v41  ;;  %v815_v41 = vadd.f32 0.5, %v811_v54  ;;  %v826_v32 = vadd.f32 0.5, %v822_v20  ;;  %v835_v55 = vmul.f32 %v1919_v49, %v823_v33 }
 0x141   : >> { %v836_v21 = vmul.f32 %v1915_v48, %v824_v4 }
 0x142   : >> { %v777_v30 = vpop.f32.mrf.mxu2 }
 0x143   : >> { %v792_v50 = vpop.f32.mrf.mxu3  ;;  %v778_v56 = vadd.f32 %v777_v30, %v654_v52  ;;  %v818_v30 = vadd.f32 0.5, %v814_v1 }
 0x144   : >> { %v793_v9 = vadd.f32 %v792_v50, %v679_v51  ;;  %v1775_v42 = vpop.eup %1774  ;;  %v772_v51 = vadd.f32 %v2379_v40, %v644_v63  ;;  %v838_v50 = vmul.f32 %v1907_v46, %v826_v32 }
 0x145   : >> { %v1777_v31 = vpop.eup %1776  ;;  %v841_v0 = vmul.f32 %v1775_v42, %v817_v59 }
 0x146   : >> { %1780 = vtanh.f32 %v793_v9  ;;  %v1779_v62 = vpop.eup %1778  ;;  %v840_v34 = vmul.f32 %v1777_v31, %v816_v60 }
 0x147   : >> { %1782 = vtanh.f32 %v781_v3  ;;  %v2385_v47 = vadd.f32 %v841_v0, %v837_v61   ;;  %v839_v13 = vmul.f32 %v1779_v62, %v815_v41  ;;  %v2637_v62 = vmov (%p586_p8), 0  }
 0x148   : >> { %1784 = vtanh.f32 %v778_v56  ;;  %v2390_v48 = vadd.f32 %v840_v34, %v836_v21   ;;  %1798 = vset.pattern.permute.xlu0 (%p586_p8), %v2637_v62  ;;  %1799 = vset.pattern.permute.xlu1 (%p586_p8), %v2637_v62 }
 0x149   : >> { %1786 = vtanh.f32 %v775_v58  ;;  %v2623_v44 = vmov %v2385_v47  ;;  %v2394_v49 = vadd.f32 %v839_v13, %v835_v55   ;;  %961 = vperm.xlu0 (%p586_p8), %1798, %v2184_v25   ;;  %956 = vperm.xlu1 (%p586_p8), %1799, %v2179_v24   ;;  %v2650_v24 = vld [vmem:[#allocation8_spill] sm:$0xff] (%p586_p8) }
 0x14a   : >> { %1788 = vtanh.f32 %v772_v51  ;;  %v2625_v42 = vmov %v2390_v48  ;;  %1800 = vset.pattern.permute.xlu2 (%p586_p8), %v2637_v62  ;;  %v886_v25 = vperm.slane (%p586_p8), %v2650_v24, 0 }
 0x14b   : >> { %1790 = vtanh.f32 %v2623_v44  ;;  %v2626_v33 = vmov %v2394_v49  ;;  %951 = vperm.xlu2 (%p586_p8), %1800, %v2174_v23  }
 0x14c   : >> { %v1781_v57 = vpop.eup %1780 }
 0x14d   : >> { %v842_v3 = vmul.f32 %v1781_v57, %v818_v30  ;;  %v1783_v40 = vpop.eup %1782 }
 0x14e   : >> { %v1785_v35 = vpop.eup %1784  ;;  %v830_v54 = vmul.f32 0.5, %v1783_v40 }
 0x14f   : >> { %v2388_v46 = vadd.f32 %v842_v3, %v838_v50   ;;  %v1787_v52 = vpop.eup %1786  ;;  %v829_v47 = vmul.f32 0.5, %v1785_v35 }
 0x150   : >> { %v1789_v20 = vpop.eup %1788  ;;  %v828_v56 = vmul.f32 0.5, %v1787_v52  ;;  %v834_v59 = vadd.f32 0.5, %v830_v54 }
 0x151   : >> { %v2624_v9 = vmov %v2388_v46  ;;  %v1791_v53 = vpop.eup %1790  ;;  %v827_v46 = vmul.f32 0.5, %v1789_v20  ;;  %v833_v43 = vadd.f32 0.5, %v829_v47  ;;  %v2629_v47 = vmov %v2623_v44  ;;  %981 = vperm.xlu0 (%p586_p8), %1798, %v2204_v29   ;;  %976 = vperm.xlu1 (%p586_p8), %1799, %v2199_v28  }
 0x152   : >> { %1792 = vtanh.f32 %v2624_v9  ;;  %v832_v60 = vadd.f32 0.5, %v828_v56 }
 0x153   : >> { %1794 = vtanh.f32 %v2625_v42  ;;  %v831_v58 = vadd.f32 0.5, %v827_v46  ;;  %v853_v31 = vmul.f32 %v1791_v53, %v833_v43   ;;  %v2628_v46 = vmov %v2624_v9  ;;  %971 = vperm.xlu2 (%p586_p8), %1800, %v2194_v27  }
 0x154   : >> { %1796 = vtanh.f32 %v2626_v33 }
 0x155   : >> { %v2633_v51 = vmov %v853_v31 }
 0x158   : >> { %v1793_v48 = vpop.eup %1792 }
 0x159   : >> { %v854_v4 = vmul.f32 %v1793_v48, %v834_v59   ;;  %v1795_v1 = vpop.eup %1794  ;;  %v2630_v48 = vmov %v2625_v42  ;;  %1021 = vperm.xlu0 (%p586_p8), %1798, %v2244_v37   ;;  %946 = vperm.xlu1 (%p586_p8), %1799, %v2169_v22  }
 0x15a   : >> { %v1797_v49 = vpop.eup %1796  ;;  %v852_v63 = vmul.f32 %v1795_v1, %v832_v60  }
 0x15b   : >> { %871 = vmatpush.msrb.mxu1 %v854_v4  ;;  %v851_v0 = vmul.f32 %v1797_v49, %v831_v58   ;;  %v2631_v49 = vmov %v2626_v33  ;;  %v2632_v50 = vmov %v854_v4  ;;  %1627 = vmatpush.msra.mxu2 (%p586_p8), %v854_v4 }
 0x15c   : >> { %v2634_v52 = vmov %v852_v63  ;;  %1628 = vmatpush.msra.mxu3 (%p586_p8), %v854_v4  ;;  %966 = vperm.xlu2 (%p586_p8), %1800, %v2189_v26  }
 0x15d   : >> { %872 = vmatpush.msrb.mxu1 %v853_v31  ;;  %v2635_v53 = vmov %v851_v0  ;;  %1630 = vmatpush.msra.mxu2 (%p586_p8), %v853_v31 }
 0x15e   : > { %1631 = vmatpush.msra.mxu3 (%p586_p8), %v853_v31 }
 0x15f   : >> { %873 = vmatpush.msrb.mxu1 %v852_v63  ;;  %1633 = vmatpush.msra.mxu2 (%p586_p8), %v852_v63 }
 0x160   : > { %1634 = vmatpush.msra.mxu3 (%p586_p8), %v852_v63 }
 0x161   : >> { %874 = vmatpush.msrb.mxu1 %v851_v0  ;;  %1636 = vmatpush.msra.mxu2 (%p586_p8), %v851_v0 }
 0x162   : >> { %1583 = vmatmul.msk.f32.vlgmr.msrb.gmra.mxu1 %vm855_vm2, %v2249_v38  ;;  %1637 = vmatpush.msra.mxu3 (%p586_p8), %v851_v0 }
 0x163   : > { %1626 = vmatpush.msra.mxu1 (%p586_p8), %v854_v4  ;;  %1016 = vperm.xlu0 (%p586_p8), %1798, %v2239_v36  }
 0x165   : > { %1629 = vmatpush.msra.mxu1 (%p586_p8), %v853_v31 }
 0x167   : > { %1632 = vmatpush.msra.mxu1 (%p586_p8), %v852_v63 }
 0x169   : > { %1635 = vmatpush.msra.mxu1 (%p586_p8), %v851_v0 }
 0x1a5   : > { %v952_v29 = vpop.permute.xlu2 (%p586_p8), %951 }
 0x1ad   : > { %v972_v21 = vpop.permute.xlu2 (%p586_p8), %971 }
 0x1b6   : > { %v967_v57 = vpop.permute.xlu2 (%p586_p8), %966 }
 0x1bb   : > { %v2493_v28 = vpop.permute.xlu0 (%p586_p8), %961 }
 0x1c3   : > { %v2495_v36 = vpop.permute.xlu0 (%p586_p8), %981 }
 0x1cb   : > { %v2497_v34 = vpop.permute.xlu0 (%p586_p8), %1021 }
 0x1d5   : > { %v2499_v13 = vpop.permute.xlu0 (%p586_p8), %1016 }
 0x1df   : >> { %v876_v41 = vpop.f32.mrf.mxu1  ;;  %588 = sbr.rel (!%p586_p8) target bundleno = 146 (0x92), region = 222 }
 0x1e0   : >> { %v2401_v2 = vsub.f32 %v1939_v2, %v876_v41  }
 0x1e2   : >> { %v2627_v32 = vmov %v2401_v2 }
 0x1e3   : >> { %v2636_v2 = vmov %v2627_v32  ;;  %908 = vmatpush.msra.mxu0 (%p586_p8), %v2627_v32 }
 0x1e4   : > { %1584 = vmatmul.msk.f32.vlgmr.msra.gmra.mxu0 %vm889_vm3, %v2254_v39  ;;  %v942_v2 = vsub.f32 %v2627_v32, %v2084_v5  ;;  %v2638_v5 = vld [vmem:[#allocation16_spill] sm:$0xff]  ;;  %s2653_s26 = sld [smem:[#allocation23_spill]] (%p2044_p4) }
 0x1e5   : > { %1083 = vmatpush.msrb.mxu0 %v854_v4  ;;  %1001 = vperm.xlu0 %1798, %v2638_v5  }
 0x1e6   : > { %v943_v51 = vmul.f32 %v942_v2, %v2274_v45  ;;  %v957_v45 = vpop.permute.xlu1 %956 }
 0x1e7   : > { %1084 = vmatpush.msrb.mxu0 %v853_v31 }
 0x1e8   : > { %1639 = vmatpush.msra.mxu2 %v943_v51  ;;  %1640 = vmatpush.msra.mxu3 %v943_v51 }
 0x1e9   : > { %1085 = vmatpush.msrb.mxu0 %v852_v63  ;;  %1638 = vmatpush.msra.mxu1 %v943_v51 }
 0x1ea   : > { %1642 = vmatpush.msra.mxu2 %v2627_v32  ;;  %1643 = vmatpush.msra.mxu3 %v2627_v32 }
 0x1eb   : > { %1086 = vmatpush.msrb.mxu0 %v851_v0  ;;  %1593 = vmatmul.msk.f32.vlgmr.msra.gmra.mxu2 %vm681_vm1, %v2129_v14  ;;  %v2643_v14 = vld [vmem:[#allocation17_spill] sm:$0xff] }
 0x1ec   : > { %1596 = vmatmul.msk.f32.vlgmr.msra.gmra.mxu3 %vm681_vm1, %v2144_v17  ;;  %1641 = vmatpush.msra.mxu1 %v2627_v32  ;;  %v2648_v17 = vld [vmem:[#allocation7_spill] sm:$0xff] }
 0x1ed   : > { %1087 = vmatpush.msrb.mxu0 %v943_v51  ;;  %1589 = vmatmul.msk.f32.vlgmr.msra.gmra.mxu1 %vm681_vm1, %v2109_v10  ;;  %v2641_v10 = vld [vmem:[#allocation9_spill] sm:$0xff] }
 0x1ee   : > { %1006 = vperm.xlu2 %1800, %v2643_v14   ;;  %v977_v30 = vpop.permute.xlu1 %976 }
 0x1ef   : > { %1088 = vmatpush.msrb.mxu0 %v2627_v32 }
 0x1f0   : > { %1585 = vmatmul.msk.f32.vlgmr.msrb.gmra.mxu0 %vm681_vm1, %v2089_v6  ;;  %v2639_v6 = vld [vmem:[#allocation11_spill] sm:$0xff] }
 0x1f3   : > { %1594 = vmatmul.msk.f32.gmra.mxu2 %vm681_vm1, %v2134_v15  ;;  %v2646_v15 = vld [vmem:[#allocation15_spill] sm:$0xff] }
 0x1f4   : > { %1597 = vmatmul.msk.f32.gmra.mxu3 %vm681_vm1, %v2149_v18  ;;  %v880_v18 = vsub.f32 %v2627_v32, %v2648_v17 }
 0x1f5   : > { %1590 = vmatmul.msk.f32.gmra.mxu1 %vm681_vm1, %v2114_v11  ;;  %v2642_v11 = vld [vmem:[#allocation10_spill] sm:$0xff] }
 0x1f6   : > { %v947_v35 = vpop.permute.xlu1 %946 }
 0x1f8   : > { %1586 = vmatmul.msk.f32.gmra.mxu0 %vm681_vm1, %v2094_v7  ;;  %v2640_v7 = vld [vmem:[#allocation18_spill] sm:$0xff] }
 0x1f9   : > { %1011 = vperm.xlu1 %1799, %v2640_v7  }
 0x1fb   : > { %1595 = vmatmul.msk.f32.gmra.mxu2 %vm681_vm1, %v2139_v16  ;;  %v2647_v16 = vld [vmem:[#allocation14_spill] sm:$0xff] }
 0x1fc   : > { %1598 = vmatmul.msk.f32.gmra.mxu3 %vm681_vm1, %v2154_v19  ;;  %991 = vperm.xlu2 %1800, %v2647_v16   ;;  %v2649_v19 = vld [vmem:[#allocation21_spill] sm:$0xff] }
 0x1fd   : > { %1591 = vmatmul.msk.f32.gmra.mxu1 %vm681_vm1, %v2119_v12  ;;  %v2645_v12 = vld [vmem:[#allocation12_spill] sm:$0xff]  ;;  %v881_v22 = vmul.f32 %v880_v18, %v2649_v19 }
 0x1ff   : > { %v883_v23 = vmul.f32 %v881_v22, %v881_v22  ;;  %vm882_vm4 = vcmp.ne.f32.partialorder %v881_v22, %v881_v22 }
 0x200   : > { %1587 = vmatmul.msk.f32.gmra.mxu0 %vm681_vm1, %v2099_v8  ;;  %v2644_v8 = vld [vmem:[#allocation13_spill] sm:$0xff] }
 0x201   : > { %986 = vperm.xlu0 %1798, %v2644_v8   ;;  %996 = vperm.xlu1 %1799, %v2646_v15   ;;  %v884_v26 = vsel %vm882_vm4, 0.0, %v883_v23 }
 0x202   : > { %v888_v27 = vmul.f32 %v886_v25, %v884_v26 }
 0x204   : > { %1599 = vmatmul.msk.f32.gmra.mxu3 %vm681_vm1, %v2639_v6 }
 0x205   : > { %1592 = vmatmul.msk.f32.gmra.mxu1 %vm681_vm1, %v2642_v11 }
 0x208   : > { %1588 = vmatmul.msk.f32.gmra.mxu0 %vm681_vm1, %v2641_v10 }
 0x20c   : > { %1600 = vmatmul.msk.f32.gmra.mxu3 %vm681_vm1, %v2645_v12 }
 0x225   : > { %929 = vadd.xlane.f32.xlu2 %v888_v27 }
 0x248   : > { %v1007_v59 = vpop.permute.xlu2 %1006 }
 0x256   : > { %v992_v8 = vpop.permute.xlu2 %991 }
 0x257   : > { %v2503_v56 = vpop.permute.xlu0 %1001 }
 0x261   : > { %v910_v37 = vpop.f32.mrf.mxu0 }
 0x262   : > { %v913_v39 = vmul.f32 %v910_v37, %v910_v37 }
 0x264   : > { %v914_v61 = vmul.f32 %v913_v39, %v886_v25 }
 0x266   : > { %915 = vadd.xlane.f32.xlu1 %v914_v61 }
 0x26a   : > { %v1102_v50 = vpop.f32.mrf.mxu1 }
 0x26b   : > { %v1103_v3 = vadd.f32 %v1102_v50, %v967_v57  ;;  %v1012_v63 = vpop.permute.xlu1 %1011 }
 0x26d   : > { %v1090_v55 = vpop.f32.mrf.mxu0  ;;  %1801 = vtanh.f32 %v1103_v3 }
 0x26e   : > { %v1114_v52 = vpop.f32.mrf.mxu2  ;;  %v1091_v54 = vadd.f32 %v1090_v55, %v947_v35 }
 0x26f   : > { %v2501_v40 = vpop.f32.mrf.mxu3 }
 0x270   : > { %1803 = vtanh.f32 %v1091_v54 }
 0x272   : > { %v1105_v20 = vpop.f32.mrf.mxu1 }
 0x273   : > { %v1802_v53 = vpop.eup %1801  ;;  %v1106_v43 = vadd.f32 %v1105_v20, %v972_v21  ;;  %v987_v41 = vpop.permute.xlu0 %986 }
 0x274   : > { %v1162_v60 = vmul.f32 0.5, %v1802_v53  ;;  %v1115_v6 = vadd.f32 %v1114_v52, %v987_v41 }
 0x275   : > { %v1093_v47 = vpop.f32.mrf.mxu0  ;;  %1805 = vtanh.f32 %v1106_v43 }
 0x276   : > { %v1094_v46 = vadd.f32 %v1093_v47, %v952_v29  ;;  %v1804_v1 = vpop.eup %1803  ;;  %v1117_v31 = vpop.f32.mrf.mxu2  ;;  %v1166_v49 = vadd.f32 0.5, %v1162_v60 }
 0x277   : > { %v1126_v48 = vpop.f32.mrf.mxu3  ;;  %v1154_v58 = vmul.f32 0.5, %v1804_v1  ;;  %v1118_v17 = vadd.f32 %v1117_v31, %v992_v8  ;;  %v997_v29 = vpop.permute.xlu1 %996 }
 0x278   : > { %v1127_v4 = vadd.f32 %v1126_v48, %v1007_v59  ;;  %1807 = vtanh.f32 %v1094_v46  ;;  %v1178_v14 = vmul.f32 %v1166_v49, %v2626_v33 }
 0x279   : > { %v1158_v5 = vadd.f32 0.5, %v1154_v58 }
 0x27a   : > { %1809 = vtanh.f32 %v1127_v4  ;;  %v1108_v62 = vpop.f32.mrf.mxu1 }
 0x27b   : > { %v1806_v51 = vpop.eup %1805  ;;  %v1109_v7 = vadd.f32 %v1108_v62, %v977_v30 }
 0x27c   : > { %v1163_v16 = vmul.f32 0.5, %v1806_v51 }
 0x27d   : > { %v1096_v0 = vpop.f32.mrf.mxu0 }
 0x27e   : > { %v1097_v2 = vadd.f32 %v1096_v0, %v957_v45  ;;  %v1808_v11 = vpop.eup %1807  ;;  %v1120_v24 = vpop.f32.mrf.mxu2  ;;  %v1167_v26 = vadd.f32 0.5, %v1163_v16 }
 0x27f   : > { %v1129_v10 = vpop.f32.mrf.mxu3  ;;  %v1155_v19 = vmul.f32 0.5, %v1808_v11  ;;  %v1121_v3 = vadd.f32 %v1120_v24, %v997_v29  ;;  %v2652_v24 = vld [vmem:[#allocation19_spill] sm:$0xff] }
 0x280   : > { %1811 = vtanh.f32 %v1097_v2  ;;  %v1130_v12 = vadd.f32 %v1129_v10, %v1012_v63  ;;  %v1810_v15 = vpop.eup %1809 }
 0x281   : > { %1813 = vtanh.f32 %v1115_v6  ;;  %v1182_v18 = vmul.f32 %v1810_v15, %v1158_v5  ;;  %v1159_v61 = vadd.f32 0.5, %v1155_v19 }
 0x282   : > { %1815 = vtanh.f32 %v1109_v7  ;;  %v1111_v33 = vpop.f32.mrf.mxu1 }
 0x283   : > { %1817 = vtanh.f32 %v1130_v12  ;;  %v1186_v22 = vadd.f32 %v1182_v18, %v1178_v14  ;;  %v1112_v39 = vadd.f32 %v1111_v33, %v2495_v36  ;;  %v2651_v18 = vld [vmem:[#allocation20_spill] sm:$0xff] }
 0x284   : > { %1819 = vtanh.f32 %v1118_v17 }
 0x285   : > { %v1099_v23 = vpop.f32.mrf.mxu0  ;;  %1228 = vst [vmem:[%s2280_s24] sm:$0xff] %v1186_v22  ;;  %1821 = vtanh.f32 %v1186_v22 }
 0x286   : > { %v1812_v25 = vpop.eup %1811  ;;  %v1100_v27 = vadd.f32 %v1099_v23, %v2493_v28  ;;  %v1179_v28 = vmul.f32 %v1167_v26, %v2625_v42  ;;  %v1124_v42 = vadd.f32 %v2501_v40, %v2503_v56 }
 0x287   : > { %v1814_v37 = vpop.eup %1813  ;;  %v1132_v30 = vpop.f32.mrf.mxu3  ;;  %v1156_v54 = vmul.f32 0.5, %v1812_v25 }
 0x288   : > { %v1816_v45 = vpop.eup %1815  ;;  %v1170_v21 = vmul.f32 0.5, %v1814_v37  ;;  %1823 = vtanh.f32 %v1100_v27  ;;  %v1133_v50 = vadd.f32 %v1132_v30, %v2499_v13 }
 0x289   : > { %v1818_v57 = vpop.eup %1817  ;;  %v1164_v55 = vmul.f32 0.5, %v1816_v45  ;;  %1825 = vtanh.f32 %v1112_v39  ;;  %v1160_v46 = vadd.f32 0.5, %v1156_v54 }
 0x28a   : > { %v1174_v35 = vadd.f32 0.5, %v1170_v21  ;;  %v1183_v52 = vmul.f32 %v1818_v57, %v1159_v61  ;;  %1827 = vtanh.f32 %v1133_v50  ;;  %v1820_v36 = vpop.eup %1819 }
 0x28b   : > { %v1168_v20 = vadd.f32 0.5, %v1164_v55  ;;  %v1822_v53 = vpop.eup %1821  ;;  %1829 = vtanh.f32 %v1121_v3  ;;  %v1171_v48 = vmul.f32 0.5, %v1820_v36 }
 0x28c   : > { %v1187_v47 = vadd.f32 %v1183_v52, %v1179_v28  ;;  %v1194_v43 = vmul.f32 %v1822_v53, %v1174_v35  ;;  %v1232_v52 = vlaneseq }
 0x28d   : > { %v1180_v60 = vmul.f32 %v1168_v20, %v2623_v44  ;;  %v1175_v41 = vadd.f32 0.5, %v1171_v48 }
 0x28e   : > { %v1824_v59 = vpop.eup %1823  ;;  %1229 = vst [vmem:[%s2280_s24 + $0x8] sm:$0xff] %v1187_v47  ;;  %1831 = vtanh.f32 %v1187_v47  ;;  %v1233_v54 = vshrl.u32 %v1232_v52, 7 }
 0x28f   : > { %v1826_v13 = vpop.eup %1825  ;;  %v1135_v1 = vpop.f32.mrf.mxu3  ;;  %1224 = vst [vmem:[%s2277_s23] sm:$0xff] %v1194_v43  ;;  %v1157_v63 = vmul.f32 0.5, %v1824_v59 }
 0x290   : > { %v1165_v4 = vmul.f32 0.5, %v1826_v13  ;;  %v1828_v58 = vpop.eup %1827  ;;  %v1136_v31 = vadd.f32 %v1135_v1, %v2497_v34  ;;  %vm1234_vm6 = vcmp.eq.s32.totalorder %v1233_v54, 0  ;;  %vm1237_vm7 = vcmp.eq.s32.totalorder %v1233_v54, 1 }
 0x291   : > { %v1184_v49 = vmul.f32 %v1828_v58, %v1160_v46  ;;  %v1830_v0 = vpop.eup %1829  ;;  %v1161_v44 = vadd.f32 0.5, %v1157_v63 }
 0x292   : > { %1833 = vtanh.f32 %v1136_v31  ;;  %v1169_v51 = vadd.f32 0.5, %v1165_v4  ;;  %v1172_v56 = vmul.f32 0.5, %v1830_v0 }
 0x293   : > { %1835 = vtanh.f32 %v1124_v42  ;;  %v1188_v62 = vadd.f32 %v1184_v49, %v1180_v60 }
 0x294   : > { %v1832_v2 = vpop.eup %1831  ;;  %v1181_v5 = vmul.f32 %v1169_v51, %v2624_v9  ;;  %v1176_v10 = vadd.f32 0.5, %v1172_v56 }
 0x295   : > { %v1195_v40 = vmul.f32 %v1832_v2, %v1175_v41  ;;  %1230 = vst [vmem:[%s2280_s24 + $0x10] sm:$0xff] %v1188_v62  ;;  %1837 = vtanh.f32 %v1188_v62 }
 0x297   : > { %1225 = vst [vmem:[%s2277_s23 + $0x8] sm:$0xff] %v1195_v40 }
 0x298   : > { %v1834_v34 = vpop.eup %1833  ;;  %v930_v9 = vpop.xlane.xlu2 %929 }
 0x299   : > { %v1836_v6 = vpop.eup %1835  ;;  %v1185_v7 = vmul.f32 %v1834_v34, %v1161_v44  ;;  %v931_v19 = vmul.f32 %v930_v9, %v2651_v18 }
 0x29a   : > { %v1173_v8 = vmul.f32 0.5, %v1836_v6 }
 0x29b   : > { %v1838_v11 = vpop.eup %1837  ;;  %v1189_v14 = vadd.f32 %v1185_v7, %v1181_v5  ;;  %v932_v22 = vsel %vm918_vm5, %v931_v19, 0.0 }
 0x29c   : > { %v1196_v12 = vmul.f32 %v1838_v11, %v1176_v10  ;;  %v1177_v15 = vadd.f32 0.5, %v1173_v8  ;;  %933 = vadd.xlane.f32.xlu2 %v932_v22 }
 0x29d   : > { %1231 = vst [vmem:[%s2280_s24 + $0x18] sm:$0xff] %v1189_v14  ;;  %1839 = vtanh.f32 %v1189_v14 }
 0x29e   : > { %1226 = vst [vmem:[%s2277_s23 + $0x10] sm:$0xff] %v1196_v12  ;;  %v1302_v46 = vld [vmem:[%s2277_s23 + $0x8] sm:$0xff] (%p2044_p4) }
 0x2a3   : > { %v1840_v16 = vpop.eup %1839 }
 0x2a4   : > { %v1197_v17 = vmul.f32 %v1840_v16, %v1177_v15 }
 0x2a6   : > { %1214 = vmatpush.msrb.mxu2 %v1197_v17  ;;  %1227 = vst [vmem:[%s2277_s23 + $0x18] sm:$0xff] %v1197_v17 }
 0x2a8   : > { %1215 = vmatpush.msrb.mxu2 %v1196_v12 }
 0x2aa   : > { %1216 = vmatpush.msrb.mxu2 %v1195_v40 }
 0x2ac   : > { %1217 = vmatpush.msrb.mxu2 %v1194_v43  ;;  %v1304_v43 = vld [vmem:[%s2277_s23 + $0x10] sm:$0xff] (%p2044_p4) }
 0x2ad   : > { %1601 = vmatmul.msk.f32.vlgmr.msrb.gmra.mxu2 %vm855_vm2, %v2249_v38  ;;  %v1306_v13 = vld [vmem:[%s2277_s23 + $0x18] sm:$0xff] (%p2044_p4) }
 0x2d9   : > { %v916_v23 = vpop.xlane.xlu1 %915 }
 0x2da   : > { %v917_v25 = vmul.f32 %v916_v23, %v2652_v24 }
 0x2dc   : > { %v919_v26 = vsel %vm918_vm5, %v917_v25, 0.0 }
 0x2dd   : > { %920 = vadd.xlane.f32.xlu0 %v919_v26 }
 0x30f   : > { %v934_v27 = vpop.xlane.xlu2 %933 }
 0x310   : > { %v935_v33 = vrot.slane %v934_v27, 4 }
 0x312   : > { %v936_v29 = vadd.f32 %v935_v33, %v934_v27 }
 0x314   : > { %v937_v37 = vrot.slane %v936_v29, 2 }
 0x316   : > { %v938_v38 = vadd.f32 %v937_v37, %v936_v29 }
 0x318   : > { %v939_v57 = vrot.slane %v938_v38, 1 }
 0x31a   : > { %v940_v3 = vadd.f32 %v939_v57, %v938_v38 }
 0x330   : > { %v1219_v28 = vpop.f32.mrf.mxu2 }
 0x331   : > { %v1222_v35 = vsub.f32 %v2627_v32, %v1219_v28  ;;  %v1300_v32 = vld [vmem:[%s2277_s23] sm:$0xff] (%p2044_p4) }
 0x333   : > { %1223 = vst [vmem:[%s529_s18] sm:$0xff] %v1222_v35  ;;  %s1604_s18 = sshll.u32 (%p2044_p4), %s2033_s16, 3 }
 0x334   : > { %s1265_s19 = scalar_lea.vmem (%p2044_p4), %s2653_s26, %s1604_s18 }
 0x335   : > { %1301 = vst [vmem:[%s1265_s19] sm:$0xff] (%p2044_p4), %v1300_v32 }
 0x336   : > { %1303 = vst [vmem:[%s1265_s19 + $0x10] sm:$0xff] (%p2044_p4), %v1302_v46 }
 0x337   : > { %1305 = vst [vmem:[%s1265_s19 + $0x20] sm:$0xff] (%p2044_p4), %v1304_v43 }
 0x338   : > { %1307 = vst [vmem:[%s1265_s19 + $0x30] sm:$0xff] (%p2044_p4), %v1306_v13 }
 0x350   : > { %v921_v39 = vpop.xlane.xlu0 %920 }
 0x351   : > { %v922_v45 = vrot.slane %v921_v39, 4 }
 0x353   : > { %v923_v61 = vadd.f32 %v922_v45, %v921_v39 }
 0x355   : > { %v924_v21 = vrot.slane %v923_v61, 2 }
 0x357   : > { %v925_v30 = vadd.f32 %v924_v21, %v923_v61 }
 0x359   : > { %v926_v55 = vrot.slane %v925_v30, 1 }
 0x35b   : > { %v927_v50 = vadd.f32 %v926_v55, %v925_v30 }
 0x35d   : > { %1644 = vpush %v927_v50 }
 0x35e   : > { %1646 = vpush %v940_v3 }
 0x38e   : > { %s1645_s15 = spop %1644 }
 0x38f   : > { %v1235_v36 = vstv %s1645_s15  ;;  %s1647_s30 = spop %1646 }
 0x390   : > { %v1236_v47 = vsel %vm1234_vm6, %v1235_v36, 0.0  ;;  %v1238_v20 = vstv %s1647_s30  ;;  %1263 = sbr.rel (!%p2044_p4) target bundleno = 917 (0x395), region = 79 }
 0x391   : > { %v1239_v53 = vsel %vm1237_vm7, %v1238_v20, 0.0 }
 0x392   : > { %v1240_v59 = vadd.f32 %v1239_v53, %v1236_v47 }
 0x394   : > { %1241 = vst [vmem:[%s533_s29] sm:$0xff] %v1240_v59 }
 0x395 PF: > { %1313 = sbr.rel (!%p2044_p4) target bundleno = 929 (0x3a1), region = 117  ;;  %s1605_s27 = sshll.u32 (%p2044_p4), %s2033_s16, 3  ;;  %v1350_v48 = vld [vmem:[%s2280_s24] sm:$0xff] (%p2044_p4)  ;;  %v1352_v42 = vld [vmem:[%s2280_s24 + $0x8] sm:$0xff] (%p2044_p4)  ;;  %v1354_v60 = vld [vmem:[%s2280_s24 + $0x10] sm:$0xff] (%p2044_p4) }
 0x396   : > { %s2654_s25 = sld [smem:[#allocation24_spill]] (%p2044_p4)  ;;  %v1356_v4 = vld [vmem:[%s2280_s24 + $0x18] sm:$0xff] (%p2044_p4) }
 0x39c   : > { %s1315_s28 = scalar_lea.vmem %s2654_s25, %s1605_s27 }
 0x39d   : > { %1351 = vst [vmem:[%s1315_s28] sm:$0xff] %v1350_v48 }
 0x39e   : > { %1353 = vst [vmem:[%s1315_s28 + $0x10] sm:$0xff] %v1352_v42 }
 0x39f   : > { %1355 = vst [vmem:[%s1315_s28 + $0x20] sm:$0xff] %v1354_v60 }
 0x3a0   : > { %1357 = vst [vmem:[%s1315_s28 + $0x30] sm:$0xff] %v1356_v4 }
 0x3a1 PF: > { %s2655_s15 = sld [smem:[#allocation5_spill]] }
 0x3a2   : > { %s2656_s29 = sld [smem:[#allocation4_spill]] }
 0x3a3   : > { %s2657_s30 = sld [smem:[#allocation6_spill]] }
 0x3a7   : > { %p22_p9 = scmp.ge.s32.totalorder %s2655_s15, 4  }
 0x3a9   :  { %24 = sbr.rel (!%p22_p9) target bundleno = 6 (0x6), region = 233 }

</bundles_post_ra>
